<compile_context>
chip_gen: v5e
topology: v5e:2x2
jax: 0.10.0
libtpu: 0.0.40
codegen_flags: <defaults>
</compile_context>

<pallas_src>
import functools

import jax
import jax.numpy as jnp
from jax.experimental import pallas as pl
from jax.experimental.pallas import tpu as pltpu


def _fused_gcn_kernel(x_ref, adj_ref, w1_ref, b1_ref, w2_ref, b2_ref,
                      w3_ref, b3_ref, o_ref, *, num_classes):
    """All three GCNConv layers + ReLU + log_softmax, fully VMEM-resident."""
    adj = adj_ref[...].astype(jnp.bfloat16)  # normalized Laplacian, |a| <= 1

    def conv(h, w_ref, b_ref):
        # GCNConv(normalize=False): adj @ (h @ W) + b   (bf16 MXU, f32 accum)
        hw = jnp.dot(h.astype(jnp.bfloat16), w_ref[...].astype(jnp.bfloat16),
                     preferred_element_type=jnp.float32)
        return jnp.dot(adj, hw.astype(jnp.bfloat16),
                       preferred_element_type=jnp.float32) + b_ref[...]

    h = jnp.maximum(conv(x_ref[...], w1_ref, b1_ref), 0.0)
    # F.dropout(p=0.5) -> identity in eval mode.
    h = jnp.maximum(conv(h, w2_ref, b2_ref), 0.0)
    logits = conv(h, w3_ref, b3_ref)          # (N, C_pad); lanes >= C are padding

    # Mask padded lanes, then numerically-stable log_softmax over real classes.
    col = jax.lax.broadcasted_iota(jnp.int32, logits.shape, 1)
    logits = jnp.where(col < num_classes, logits, -jnp.inf)
    m = jnp.max(logits, axis=-1, keepdims=True)
    s = logits - m
    lse = jnp.log(jnp.sum(jnp.exp(s), axis=-1, keepdims=True))
    o_ref[...] = (s - lse).astype(o_ref.dtype)


def ogb_gcn_forward(x, adj, params):
    """Replicates OGBGCN.forward (eval mode) in one fused pallas_call."""
    (w1, b1), (w2, b2), (w3, b3) = params
    n, f_in = x.shape
    hidden = w1.shape[1]
    num_classes = w3.shape[1]

    # Pad the tiny class dimension up to a full 128-lane slab so the final
    # matmul and output stores are lane-dense; slice the real classes after.
    c_pad = ((num_classes + 127) // 128) * 128
    w3p = jnp.zeros((hidden, c_pad), w3.dtype).at[:, :num_classes].set(w3)
    b3p = jnp.zeros((c_pad,), b3.dtype).at[:num_classes].set(b3)

    kernel = functools.partial(_fused_gcn_kernel, num_classes=num_classes)

    def full(shape):
        return pl.BlockSpec(shape, lambda i: (0,) * len(shape))

    out = pl.pallas_call(
        kernel,
        out_shape=jax.ShapeDtypeStruct((n, c_pad), jnp.float32),
        grid=(1,),
        in_specs=[
            full((n, f_in)),          # x
            full((n, n)),             # adj (normalized)
            full((f_in, hidden)),     # W1
            full((1, hidden)),        # b1
            full((hidden, hidden)),   # W2
            full((1, hidden)),        # b2
            full((hidden, c_pad)),    # W3 (lane-padded)
            full((1, c_pad)),         # b3 (lane-padded)
        ],
        out_specs=full((n, c_pad)),
        compiler_params=pltpu.CompilerParams(
            dimension_semantics=("arbitrary",),
        ),
    )(x, adj, w1, b1.reshape(1, hidden), w2, b2.reshape(1, hidden),
      w3p, b3p.reshape(1, c_pad))
    return out[:, :num_classes]


def ogb_gcn_reference(x, adj, params):
    """Plain-JAX reference with the same bf16-matmul / f32-accum numerics."""
    h = x
    n_layers = len(params)
    for li, (w, b) in enumerate(params):
        hw = jnp.dot(h.astype(jnp.bfloat16), w.astype(jnp.bfloat16),
                     preferred_element_type=jnp.float32)
        h = jnp.dot(adj.astype(jnp.bfloat16), hw.astype(jnp.bfloat16),
                    preferred_element_type=jnp.float32) + b
        if li < n_layers - 1:
            h = jnp.maximum(h, 0.0)
    return jax.nn.log_softmax(h, axis=-1)


def glorot(key, shape):
    fan_in, fan_out = shape
    limit = jnp.sqrt(6.0 / (fan_in + fan_out))
    return jax.random.uniform(key, shape, jnp.float32, -limit, limit)


if __name__ == "__main__":
    # Small problem consistent with the module: 3 GCN layers, hidden_channels=256.
    N = 128                 # nodes
    IN_CHANNELS = 16        # info['num_node_features']
    HIDDEN = 256            # hardcoded in OGBGCN
    NUM_CLASSES = 8         # info['num_classes']

    key = jax.random.PRNGKey(0)
    kx, ka, k1, k2, k3 = jax.random.split(key, 5)

    # Node features.
    x = jax.random.normal(kx, (N, IN_CHANNELS), dtype=jnp.float32)

    # Dense adjacency + GCN normalization (plain-JAX glue, as in the docstring).
    a = (jax.random.uniform(ka, (N, N)) < 0.05).astype(jnp.float32)
    a = jnp.maximum(a, a.T)                       # symmetrize
    a = a + jnp.eye(N, dtype=jnp.float32)         # set_diag()
    deg = a.sum(axis=1)
    dinv = jnp.where(deg > 0, deg ** -0.5, 0.0)
    adj = dinv[:, None] * a * dinv[None, :]

    # Deterministic parameter init (GCNConv: glorot weight, zero bias).
    params = [
        (glorot(k1, (IN_CHANNELS, HIDDEN)), jnp.zeros((HIDDEN,), jnp.float32)),
        (glorot(k2, (HIDDEN, HIDDEN)), jnp.zeros((HIDDEN,), jnp.float32)),
        (glorot(k3, (HIDDEN, NUM_CLASSES)), jnp.zeros((NUM_CLASSES,), jnp.float32)),
    ]

    out = jax.jit(ogb_gcn_forward)(x, adj, params)
    out = jax.block_until_ready(out)

    assert out.shape == (N, NUM_CLASSES)
    # log_softmax rows should sum (in prob space) to ~1.
    assert bool(jnp.allclose(jnp.exp(out).sum(-1), 1.0, atol=1e-4))
    # Match the plain-JAX reference (same bf16/f32 numerics).
    ref = jax.jit(ogb_gcn_reference)(x, adj, params)
    assert bool(jnp.allclose(out, ref, atol=5e-2, rtol=5e-2))
    print("KERNEL_OK")
</pallas_src>

<mosaic_0001>
module attributes {stable_mosaic.version = 11 : i64} {
  func.func @_fused_gcn_kernel(%arg0: i32, %arg1: memref<128x16xf32, #tpu.memory_space<vmem>>, %arg2: memref<128x128xf32, #tpu.memory_space<vmem>>, %arg3: memref<16x256xf32, #tpu.memory_space<vmem>>, %arg4: memref<1x256xf32, #tpu.memory_space<vmem>>, %arg5: memref<256x256xf32, #tpu.memory_space<vmem>>, %arg6: memref<1x256xf32, #tpu.memory_space<vmem>>, %arg7: memref<256x128xf32, #tpu.memory_space<vmem>>, %arg8: memref<1x128xf32, #tpu.memory_space<vmem>>, %arg9: memref<128x128xf32, #tpu.memory_space<vmem>>) attributes {dimension_semantics = [#tpu.dimension_semantics<arbitrary>], iteration_bounds = array<i64: 1>, scalar_prefetch = 0 : i64, scratch_operands = 0 : i64, tpu.core_type = #tpu.core_type<tc>, window_params = [{pipeline_mode = #tpu.pipeline_mode<synchronous>, transform_indices = @transform_0, window_bounds = array<i64: 128, 16>}, {pipeline_mode = #tpu.pipeline_mode<synchronous>, transform_indices = @transform_1, window_bounds = array<i64: 128, 128>}, {pipeline_mode = #tpu.pipeline_mode<synchronous>, transform_indices = @transform_2, window_bounds = array<i64: 16, 256>}, {pipeline_mode = #tpu.pipeline_mode<synchronous>, transform_indices = @transform_3, window_bounds = array<i64: 1, 256>}, {pipeline_mode = #tpu.pipeline_mode<synchronous>, transform_indices = @transform_4, window_bounds = array<i64: 256, 256>}, {pipeline_mode = #tpu.pipeline_mode<synchronous>, transform_indices = @transform_5, window_bounds = array<i64: 1, 256>}, {pipeline_mode = #tpu.pipeline_mode<synchronous>, transform_indices = @transform_6, window_bounds = array<i64: 256, 128>}, {pipeline_mode = #tpu.pipeline_mode<synchronous>, transform_indices = @transform_7, window_bounds = array<i64: 1, 128>}, {pipeline_mode = #tpu.pipeline_mode<synchronous>, transform_indices = @transform_8, window_bounds = array<i64: 128, 128>}]} {
    %c0 = arith.constant 0 : index
    %c0_0 = arith.constant 0 : index
    %0 = vector.load %arg2[%c0, %c0_0] : memref<128x128xf32, #tpu.memory_space<vmem>>, vector<128x128xf32>
    %1 = arith.truncf %0 : vector<128x128xf32> to vector<128x128xbf16>
    %c0_1 = arith.constant 0 : index
    %c0_2 = arith.constant 0 : index
    %2 = vector.load %arg1[%c0_1, %c0_2] : memref<128x16xf32, #tpu.memory_space<vmem>>, vector<128x16xf32>
    %3 = arith.truncf %2 : vector<128x16xf32> to vector<128x16xbf16>
    %c0_3 = arith.constant 0 : index
    %c0_4 = arith.constant 0 : index
    %4 = vector.load %arg3[%c0_3, %c0_4] : memref<16x256xf32, #tpu.memory_space<vmem>>, vector<16x256xf32>
    %5 = arith.truncf %4 : vector<16x256xf32> to vector<16x256xbf16>
    %cst = arith.constant dense<0.000000e+00> : vector<128x256xf32>
    %6 = tpu.matmul %3, %5, %cst {dimension_numbers = #tpu.dot_dimension_numbers<[1], [0], [0], [1], [0, 0, 1, 1], [], []>} : vector<128x16xbf16>, vector<16x256xbf16>, vector<128x256xf32> -> vector<128x256xf32>
    %7 = arith.truncf %6 : vector<128x256xf32> to vector<128x256xbf16>
    %cst_5 = arith.constant dense<0.000000e+00> : vector<128x256xf32>
    %8 = tpu.matmul %1, %7, %cst_5 {dimension_numbers = #tpu.dot_dimension_numbers<[1], [0], [0], [1], [0, 0, 1, 1], [], []>} : vector<128x128xbf16>, vector<128x256xbf16>, vector<128x256xf32> -> vector<128x256xf32>
    %c0_6 = arith.constant 0 : index
    %c0_7 = arith.constant 0 : index
    %9 = vector.load %arg4[%c0_6, %c0_7] : memref<1x256xf32, #tpu.memory_space<vmem>>, vector<1x256xf32>
    %10 = vector.broadcast %9 : vector<1x256xf32> to vector<128x256xf32>
    %11 = arith.addf %8, %10 : vector<128x256xf32>
    %cst_8 = arith.constant 0.000000e+00 : f32
    %12 = vector.broadcast %cst_8 : f32 to vector<128x256xf32>
    %13 = arith.maximumf %11, %12 : vector<128x256xf32>
    %14 = arith.truncf %13 : vector<128x256xf32> to vector<128x256xbf16>
    %c0_9 = arith.constant 0 : index
    %c0_10 = arith.constant 0 : index
    %15 = vector.load %arg5[%c0_9, %c0_10] : memref<256x256xf32, #tpu.memory_space<vmem>>, vector<256x256xf32>
    %16 = arith.truncf %15 : vector<256x256xf32> to vector<256x256xbf16>
    %cst_11 = arith.constant dense<0.000000e+00> : vector<128x256xf32>
    %17 = tpu.matmul %14, %16, %cst_11 {dimension_numbers = #tpu.dot_dimension_numbers<[1], [0], [0], [1], [0, 0, 1, 1], [], []>} : vector<128x256xbf16>, vector<256x256xbf16>, vector<128x256xf32> -> vector<128x256xf32>
    %18 = arith.truncf %17 : vector<128x256xf32> to vector<128x256xbf16>
    %cst_12 = arith.constant dense<0.000000e+00> : vector<128x256xf32>
    %19 = tpu.matmul %1, %18, %cst_12 {dimension_numbers = #tpu.dot_dimension_numbers<[1], [0], [0], [1], [0, 0, 1, 1], [], []>} : vector<128x128xbf16>, vector<128x256xbf16>, vector<128x256xf32> -> vector<128x256xf32>
    %c0_13 = arith.constant 0 : index
    %c0_14 = arith.constant 0 : index
    %20 = vector.load %arg6[%c0_13, %c0_14] : memref<1x256xf32, #tpu.memory_space<vmem>>, vector<1x256xf32>
    %21 = vector.broadcast %20 : vector<1x256xf32> to vector<128x256xf32>
    %22 = arith.addf %19, %21 : vector<128x256xf32>
    %cst_15 = arith.constant 0.000000e+00 : f32
    %23 = vector.broadcast %cst_15 : f32 to vector<128x256xf32>
    %24 = arith.maximumf %22, %23 : vector<128x256xf32>
    %25 = arith.truncf %24 : vector<128x256xf32> to vector<128x256xbf16>
    %c0_16 = arith.constant 0 : index
    %c0_17 = arith.constant 0 : index
    %26 = vector.load %arg7[%c0_16, %c0_17] : memref<256x128xf32, #tpu.memory_space<vmem>>, vector<256x128xf32>
    %27 = arith.truncf %26 : vector<256x128xf32> to vector<256x128xbf16>
    %cst_18 = arith.constant dense<0.000000e+00> : vector<128x128xf32>
    %28 = tpu.matmul %25, %27, %cst_18 {dimension_numbers = #tpu.dot_dimension_numbers<[1], [0], [0], [1], [0, 0, 1, 1], [], []>} : vector<128x256xbf16>, vector<256x128xbf16>, vector<128x128xf32> -> vector<128x128xf32>
    %29 = arith.truncf %28 : vector<128x128xf32> to vector<128x128xbf16>
    %cst_19 = arith.constant dense<0.000000e+00> : vector<128x128xf32>
    %30 = tpu.matmul %1, %29, %cst_19 {dimension_numbers = #tpu.dot_dimension_numbers<[1], [0], [0], [1], [0, 0, 1, 1], [], []>} : vector<128x128xbf16>, vector<128x128xbf16>, vector<128x128xf32> -> vector<128x128xf32>
    %c0_20 = arith.constant 0 : index
    %c0_21 = arith.constant 0 : index
    %31 = vector.load %arg8[%c0_20, %c0_21] : memref<1x128xf32, #tpu.memory_space<vmem>>, vector<1x128xf32>
    %32 = vector.broadcast %31 : vector<1x128xf32> to vector<128x128xf32>
    %33 = arith.addf %30, %32 : vector<128x128xf32>
    %34 = tpu.iota {dimensions = array<i32: 1>} : vector<128x128xi32>
    %c8_i32 = arith.constant 8 : i32
    %35 = vector.broadcast %c8_i32 : i32 to vector<128x128xi32>
    %36 = arith.cmpi slt, %34, %35 : vector<128x128xi32>
    %cst_22 = arith.constant 0xFF800000 : f32
    %37 = vector.broadcast %cst_22 : f32 to vector<128x128xf32>
    %38 = arith.select %36, %33, %37 : vector<128x128xi1>, vector<128x128xf32>
    %cst_23 = arith.constant dense<0xFF800000> : vector<128xf32>
    %39 = vector.multi_reduction <maximumf>, %38, %cst_23 [1] : vector<128x128xf32> to vector<128xf32>
    %40 = vector.shape_cast %39 : vector<128xf32> to vector<128x1xf32>
    %41 = vector.broadcast %40 : vector<128x1xf32> to vector<128x128xf32>
    %42 = arith.subf %38, %41 : vector<128x128xf32>
    %43 = math.exp %42 : vector<128x128xf32>
    %cst_24 = arith.constant dense<0.000000e+00> : vector<128xf32>
    %44 = vector.multi_reduction <add>, %43, %cst_24 [1] : vector<128x128xf32> to vector<128xf32>
    %45 = vector.shape_cast %44 : vector<128xf32> to vector<128x1xf32>
    %46 = math.log %45 : vector<128x1xf32>
    %47 = vector.broadcast %46 : vector<128x1xf32> to vector<128x128xf32>
    %48 = arith.subf %42, %47 : vector<128x128xf32>
    %c0_25 = arith.constant 0 : index
    %c0_26 = arith.constant 0 : index
    %49 = vector.load %arg9[%c0_25, %c0_26] : memref<128x128xf32, #tpu.memory_space<vmem>>, vector<128x128xf32>
    tpu.vector_store %arg9[%c0_25, %c0_26], %48 {strides = array<i32>} : memref<128x128xf32, #tpu.memory_space<vmem>>, vector<128x128xf32>,
    return
  }
  func.func @transform_0(%arg0: i32) -> (i32, i32) {
    %c0_i32 = arith.constant 0 : i32
    %c0_i32_0 = arith.constant 0 : i32
    %c0_i32_1 = arith.constant 0 : i32
    return %c0_i32, %c0_i32_0 : i32, i32
  }
  func.func @transform_1(%arg0: i32) -> (i32, i32) {
    %c0_i32 = arith.constant 0 : i32
    %c0_i32_0 = arith.constant 0 : i32
    %c0_i32_1 = arith.constant 0 : i32
    return %c0_i32, %c0_i32_0 : i32, i32
  }
  func.func @transform_2(%arg0: i32) -> (i32, i32) {
    %c0_i32 = arith.constant 0 : i32
    %c0_i32_0 = arith.constant 0 : i32
    %c0_i32_1 = arith.constant 0 : i32
    return %c0_i32, %c0_i32_0 : i32, i32
  }
  func.func @transform_3(%arg0: i32) -> (i32, i32) {
    %c0_i32 = arith.constant 0 : i32
    %c0_i32_0 = arith.constant 0 : i32
    %c0_i32_1 = arith.constant 0 : i32
    return %c0_i32, %c0_i32_0 : i32, i32
  }
  func.func @transform_4(%arg0: i32) -> (i32, i32) {
    %c0_i32 = arith.constant 0 : i32
    %c0_i32_0 = arith.constant 0 : i32
    %c0_i32_1 = arith.constant 0 : i32
    return %c0_i32, %c0_i32_0 : i32, i32
  }
  func.func @transform_5(%arg0: i32) -> (i32, i32) {
    %c0_i32 = arith.constant 0 : i32
    %c0_i32_0 = arith.constant 0 : i32
    %c0_i32_1 = arith.constant 0 : i32
    return %c0_i32, %c0_i32_0 : i32, i32
  }
  func.func @transform_6(%arg0: i32) -> (i32, i32) {
    %c0_i32 = arith.constant 0 : i32
    %c0_i32_0 = arith.constant 0 : i32
    %c0_i32_1 = arith.constant 0 : i32
    return %c0_i32, %c0_i32_0 : i32, i32
  }
  func.func @transform_7(%arg0: i32) -> (i32, i32) {
    %c0_i32 = arith.constant 0 : i32
    %c0_i32_0 = arith.constant 0 : i32
    %c0_i32_1 = arith.constant 0 : i32
    return %c0_i32, %c0_i32_0 : i32, i32
  }
  func.func @transform_8(%arg0: i32) -> (i32, i32) {
    %c0_i32 = arith.constant 0 : i32
    %c0_i32_0 = arith.constant 0 : i32
    %c0_i32_1 = arith.constant 0 : i32
    return %c0_i32, %c0_i32_0 : i32, i32
  }
}

</mosaic_0001>

<bundles_post_ra>
// kernel: ogb_gcn_forward.1
= control target key start
LH: loop header
LB: loop body
LE: loop exit
PB: predicated region body
PF: predicated region fallthrough
CT: control target
= control target key end

     0   :  { %vm84_vm0 = vcmask 130048   ;;  %s2217_s2 = inlined_call_operand.vmem [shape: f32[16,256], index: 2, kind: input, shape index: {}]   ;;  %s2218_s0 = inlined_call_operand.vmem [shape: f32[128,16], index: 0, kind: input, shape index: {}]   ;;  %s2219_s1 = inlined_call_operand.vmem [shape: f32[128,128], index: 1, kind: input, shape index: {}]   ;;  %s2220_s4 = inlined_call_operand.vmem [shape: f32[256,256], index: 4, kind: input, shape index: {}]   ;;  %s2221_s3 = inlined_call_operand.vmem [shape: f32[1,256], index: 3, kind: input, shape index: {}]   ;;  %s2222_s6 = inlined_call_operand.vmem [shape: f32[256,128], index: 6, kind: input, shape index: {}]   ;;  %s2223_s5 = inlined_call_operand.vmem [shape: f32[1,256], index: 5, kind: input, shape index: {}]   ;;  %s2224_s7 = inlined_call_operand.vmem [shape: f32[1,128], index: 7, kind: input, shape index: {}]   ;;  %s2225_s8 = inlined_call_operand.vmem [shape: f32[128,128], index: 8, kind: output, shape index: {}]  }
   0x1   :  { %v78_v0 = vld [vmem:[%s2217_s2] sm:$0xff]  ;;  %v80_v1 = vld [vmem:[%s2217_s2 + $0x10] sm:$0xff]  ;;  %v59_v4 = vld [vmem:[%s2218_s0 + $0x28] sm:$0xff] }
   0x2   :  { %v58_v2 = vld [vmem:[%s2218_s0 + $0x20] sm:$0xff]  ;;  %v82_v3 = vpack.c.bf16 %v80_v1, %v78_v0  ;;  %v64_v5 = vld [vmem:[%s2218_s0 + $0x50] sm:$0xff]  ;;  %v65_v6 = vld [vmem:[%s2218_s0 + $0x58] sm:$0xff] }
   0x3   :  { %v72_v7 = vpack.c.bf16 %v59_v4, %v58_v2  ;;  %v75_v8 = vpack.c.bf16 %v65_v6, %v64_v5  ;;  %v68_v9 = vld [vmem:[%s2218_s0 + $0x70] sm:$0xff]  ;;  %v69_v10 = vld [vmem:[%s2218_s0 + $0x78] sm:$0xff]  ;;  %v79_v12 = vld [vmem:[%s2217_s2 + $0x8] sm:$0xff] }
   0x4   :  { %1257 = vmatpush.bf16.msra.mxu1 %v82_v3  ;;  %1258 = vmatpush.bf16.msra.mxu2 %v82_v3  ;;  %v77_v11 = vpack.c.bf16 %v69_v10, %v68_v9  ;;  %v81_v13 = vld [vmem:[%s2217_s2 + $0x18] sm:$0xff]  ;;  %v54_v14 = vld [vmem:[%s2218_s0] sm:$0xff]  ;;  %v55_v16 = vld [vmem:[%s2218_s0 + $0x8] sm:$0xff] }
   0x5   :  { %1259 = vmatpush.bf16.msra.mxu3 %v82_v3  ;;  %116 = vmatpush.bf16.msra.mxu0 %v82_v3  ;;  %v83_v15 = vpack.c.bf16 %v81_v13, %v79_v12  ;;  %v70_v17 = vpack.c.bf16 %v55_v16, %v54_v14  ;;  %v60_v18 = vld [vmem:[%s2218_s0 + $0x30] sm:$0xff]  ;;  %v61_v19 = vld [vmem:[%s2218_s0 + $0x38] sm:$0xff]  ;;  %v66_v20 = vld [vmem:[%s2218_s0 + $0x60] sm:$0xff] }
   0x6   :  { %v67_v21 = vld [vmem:[%s2218_s0 + $0x68] sm:$0xff]  ;;  %v73_v22 = vpack.c.bf16 %v61_v19, %v60_v18  ;;  %v56_v24 = vld [vmem:[%s2218_s0 + $0x10] sm:$0xff]  ;;  %v57_v25 = vld [vmem:[%s2218_s0 + $0x18] sm:$0xff] }
   0x7   :  { %1243 = vmatmul.msk.bf16.vlgmr.msra.gmra.mxu1 %vm84_vm0, %v72_v7  ;;  %1246 = vmatmul.msk.bf16.vlgmr.msra.gmra.mxu2 %vm84_vm0, %v75_v8  ;;  %v76_v23 = vpack.c.bf16 %v67_v21, %v66_v20  ;;  %v71_v26 = vpack.c.bf16 %v57_v25, %v56_v24  ;;  %v62_v27 = vld [vmem:[%s2218_s0 + $0x40] sm:$0xff]  ;;  %v63_v28 = vld [vmem:[%s2218_s0 + $0x48] sm:$0xff]  ;;  %v33_v9 = vld [vmem:[%s2219_s1 + $0x18] sm:$0xff] }
   0x8   :  { %1248 = vmatmul.msk.bf16.vlgmr.msra.gmra.mxu3 %vm84_vm0, %v77_v11  ;;  %165 = vmatpush.bf16.msrb.mxu1 %v83_v15  ;;  %v74_v29 = vpack.c.bf16 %v63_v28, %v62_v27  ;;  %v30_v3 = vld [vmem:[%s2219_s1] sm:$0xff]  ;;  %v31_v4 = vld [vmem:[%s2219_s1 + $0x8] sm:$0xff] }
   0x9   :  { %1241 = vmatmul.msk.bf16.vlgmr.msra.gmra.mxu0 %vm84_vm0, %v70_v17  ;;  %v1452_v6 = vpack.c.bf16 %v31_v4, %v30_v3  ;;  %v34_v15 = vld [vmem:[%s2219_s1 + $0x20] sm:$0xff]  ;;  %v35_v16 = vld [vmem:[%s2219_s1 + $0x28] sm:$0xff]  ;;  %v437_v3 = vld [vmem:[%s2220_s4 + $0x1f0] sm:$0xff] }
   0xa   :  { %v1470_v18 = vpack.c.bf16 %v35_v16, %v34_v15  ;;  %v39_v27 = vld [vmem:[%s2219_s1 + $0x48] sm:$0xff]  ;;  %v385_v15 = vld [vmem:[%s2220_s4 + $0x50] sm:$0xff]  ;;  %v431_v16 = vld [vmem:[%s2220_s4 + $0x1c0] sm:$0xff] }
   0xb   :  { %2242 = vst [vmem:[#allocation2_spill] sm:$0xff] %v1452_v6  ;;  %v388_v4 = vld [vmem:[%s2220_s4 + $0x68] sm:$0xff] }
   0xc   :  { %2244 = vst [vmem:[#allocation4_spill] sm:$0xff] %v1470_v18 }
  0x17   :  { %1244 = vmatmul.msk.bf16.gmra.mxu1 %vm84_vm0, %v73_v22  ;;  %1247 = vmatmul.msk.bf16.gmra.mxu2 %vm84_vm0, %v76_v23 }
  0x19   :  { %1242 = vmatmul.msk.bf16.gmra.mxu0 %vm84_vm0, %v71_v26 }
  0x27   :  { %1245 = vmatmul.msk.bf16.gmra.mxu1 %vm84_vm0, %v74_v29 }
  0x37   :  { %1249 = vmatmul.msk.bf16.vlgmr.msrb.gmra.mxu1 %vm84_vm0, %v70_v17 }
  0x47   :  { %1250 = vmatmul.msk.bf16.gmra.mxu1 %vm84_vm0, %v71_v26  ;;  %v38_v26 = vld [vmem:[%s2219_s1 + $0x40] sm:$0xff] }
  0x48   :  { %v1489_v28 = vpack.c.bf16 %v39_v27, %v38_v26  ;;  %v432_v26 = vld [vmem:[%s2220_s4 + $0x1c8] sm:$0xff]  ;;  %v434_v27 = vld [vmem:[%s2220_s4 + $0x1d8] sm:$0xff] }
  0x4a   :  { %2246 = vst [vmem:[#allocation6_spill] sm:$0xff] %v1489_v28 }
  0x57   :  { %1251 = vmatmul.msk.bf16.gmra.mxu1 %vm84_vm0, %v72_v7 }
  0x67   :  { %1252 = vmatmul.msk.bf16.gmra.mxu1 %vm84_vm0, %v73_v22  ;;  %v36_v22 = vld [vmem:[%s2219_s1 + $0x30] sm:$0xff] }
  0x77   :  { %1253 = vmatmul.msk.bf16.gmra.mxu1 %vm84_vm0, %v74_v29  ;;  %v40_v29 = vld [vmem:[%s2219_s1 + $0x50] sm:$0xff] }
  0x84   :  { %v128_v30 = vpop.f32.mrf.mxu1 }
  0x86   :  { %v118_v56 = vpop.f32.mrf.mxu0 }
  0x87   :  { %1254 = vmatmul.msk.bf16.gmra.mxu1 %vm84_vm0, %v75_v8  ;;  %v32_v8 = vld [vmem:[%s2219_s1 + $0x10] sm:$0xff] }
  0x8a   :  { %v143_v31 = vpop.f32.mrf.mxu2 }
  0x8b   :  { %v153_v32 = vpop.f32.mrf.mxu3 }
  0x8c   :  { %v130_v33 = vpop.f32.mrf.mxu1 }
  0x8d   :  { %v211_v48 = vpack.c.bf16 %v130_v33, %v128_v30  ;;  %v41_v30 = vld [vmem:[%s2219_s1 + $0x58] sm:$0xff]  ;;  %v43_v33 = vld [vmem:[%s2219_s1 + $0x68] sm:$0xff] }
  0x8e   :  { %v120_v58 = vpop.f32.mrf.mxu0 }
  0x8f   :  { %v207_v1 = vpack.c.bf16 %v120_v58, %v118_v56  ;;  %v391_v56 = vld [vmem:[%s2220_s4 + $0x80] sm:$0xff]  ;;  %v392_v58 = vld [vmem:[%s2220_s4 + $0x88] sm:$0xff] }
  0x92   :  { %v145_v34 = vpop.f32.mrf.mxu2 }
  0x93   :  { %v155_v35 = vpop.f32.mrf.mxu3  ;;  %v217_v43 = vpack.c.bf16 %v145_v34, %v143_v31  ;;  %v1499_v31 = vpack.c.bf16 %v41_v30, %v40_v29  ;;  %v379_v29 = vld [vmem:[%s2220_s4 + $0x20] sm:$0xff]  ;;  %v468_v30 = vpack.c.bf16 %v434_v27, %v432_v26 }
  0x94   :  { %v133_v36 = vpop.f32.mrf.mxu1  ;;  %v221_v37 = vpack.c.bf16 %v155_v35, %v153_v32  ;;  %v42_v32 = vld [vmem:[%s2219_s1 + $0x60] sm:$0xff]  ;;  %v44_v35 = vld [vmem:[%s2219_s1 + $0x70] sm:$0xff] }
  0x95   :  { %2247 = vst [vmem:[#allocation7_spill] sm:$0xff] %v1499_v31  ;;  %v1509_v34 = vpack.c.bf16 %v43_v33, %v42_v32  ;;  %v381_v32 = vld [vmem:[%s2220_s4 + $0x30] sm:$0xff]  ;;  %v427_v33 = vld [vmem:[%s2220_s4 + $0x1a0] sm:$0xff] }
  0x96   :  { %229 = vmatpush.bf16.msrb.mxu2 %v221_v37  ;;  %v123_v60 = vpop.f32.mrf.mxu0 }
  0x97   :  { %1255 = vmatmul.msk.bf16.gmra.mxu1 %vm84_vm0, %v76_v23  ;;  %v37_v23 = vld [vmem:[%s2219_s1 + $0x38] sm:$0xff]  ;;  %2248 = vst [vmem:[#allocation8_spill] sm:$0xff] %v1509_v34 }
  0x98   :  { %v1479_v25 = vpack.c.bf16 %v37_v23, %v36_v22  ;;  %v386_v22 = vld [vmem:[%s2220_s4 + $0x58] sm:$0xff] }
  0x9a   :  { %v148_v38 = vpop.f32.mrf.mxu2  ;;  %2245 = vst [vmem:[#allocation5_spill] sm:$0xff] %v1479_v25 }
  0x9c   :  { %v135_v39 = vpop.f32.mrf.mxu1 }
  0x9d   :  { %v213_v46 = vpack.c.bf16 %v135_v39, %v133_v36  ;;  %v45_v36 = vld [vmem:[%s2219_s1 + $0x78] sm:$0xff]  ;;  %v405_v39 = vld [vmem:[%s2220_s4 + $0xf0] sm:$0xff] }
  0x9e   :  { %v125_v62 = vpop.f32.mrf.mxu0  ;;  %v1519_v37 = vpack.c.bf16 %v45_v36, %v44_v35  ;;  %v429_v35 = vld [vmem:[%s2220_s4 + $0x1b0] sm:$0xff]  ;;  %v441_v36 = vpack.c.bf16 %v381_v32, %v379_v29  ;;  %v407_v29 = vld [vmem:[%s2220_s4 + $0x100] sm:$0xff]  ;;  %v408_v32 = vld [vmem:[%s2220_s4 + $0x108] sm:$0xff] }
  0x9f   :  { %v209_v63 = vpack.c.bf16 %v125_v62, %v123_v60  ;;  %v1575_v62 = vld [vmem:[%s2221_s3] sm:$0x3] }
  0xa0   :  { %2249 = vst [vmem:[#allocation9_spill] sm:$0xff] %v1519_v37 }
  0xa2   :  { %v150_v40 = vpop.f32.mrf.mxu2 }
  0xa3   :  { %v219_v41 = vpack.c.bf16 %v150_v40, %v148_v38  ;;  %v403_v38 = vld [vmem:[%s2220_s4 + $0xe0] sm:$0xff]  ;;  %v404_v40 = vld [vmem:[%s2220_s4 + $0xe8] sm:$0xff] }
  0xa4   :  { %v138_v42 = vpop.f32.mrf.mxu1 }
  0xa5   :  { %230 = vmatpush.bf16.msrb.mxu2 %v219_v41  ;;  %v453_v41 = vpack.c.bf16 %v405_v39, %v403_v38  ;;  %v380_v38 = vld [vmem:[%s2220_s4 + $0x28] sm:$0xff]  ;;  %v382_v39 = vld [vmem:[%s2220_s4 + $0x38] sm:$0xff] }
  0xa7   :  { %1256 = vmatmul.msk.bf16.gmra.mxu1 %vm84_vm0, %v77_v11  ;;  %v1461_v11 = vpack.c.bf16 %v33_v9, %v32_v8  ;;  %471 = vmatpush.bf16.msrb.mxu0 %v453_v41  ;;  %v436_v8 = vld [vmem:[%s2220_s4 + $0x1e8] sm:$0xff]  ;;  %v438_v9 = vld [vmem:[%s2220_s4 + $0x1f8] sm:$0xff] }
  0xa9   :  { %231 = vmatpush.bf16.msrb.mxu2 %v217_v43  ;;  %2243 = vst [vmem:[#allocation3_spill] sm:$0xff] %v1461_v11  ;;  %v399_v43 = vld [vmem:[%s2220_s4 + $0xc0] sm:$0xff] }
  0xac   :  { %v140_v44 = vpop.f32.mrf.mxu1 }
  0xad   :  { %v215_v45 = vpack.c.bf16 %v140_v44, %v138_v42  ;;  %v406_v42 = vld [vmem:[%s2220_s4 + $0xf8] sm:$0xff]  ;;  %v401_v44 = vld [vmem:[%s2220_s4 + $0xd0] sm:$0xff] }
  0xaf   :  { %232 = vmatpush.bf16.msrb.mxu2 %v215_v45  ;;  %v454_v45 = vpack.c.bf16 %v406_v42, %v404_v40  ;;  %v428_v40 = vld [vmem:[%s2220_s4 + $0x1a8] sm:$0xff]  ;;  %v465_v42 = vpack.c.bf16 %v429_v35, %v427_v33  ;;  %v410_v35 = vld [vmem:[%s2220_s4 + $0x118] sm:$0xff] }
  0xb3   :  { %233 = vmatpush.bf16.msrb.mxu2 %v213_v46  ;;  %v400_v46 = vld [vmem:[%s2220_s4 + $0xc8] sm:$0xff] }
  0xb4   :  { %v167_v47 = vpop.f32.mrf.mxu1 }
  0xb7   :  { %234 = vmatpush.bf16.msrb.mxu2 %v211_v48  ;;  %v451_v48 = vpack.c.bf16 %v401_v44, %v399_v43  ;;  %v430_v43 = vld [vmem:[%s2220_s4 + $0x1b8] sm:$0xff]  ;;  %v375_v44 = vld [vmem:[%s2220_s4] sm:$0xff] }
  0xb9   :  { %472 = vmatpush.bf16.msrb.mxu0 %v451_v48  ;;  %v423_v48 = vld [vmem:[%s2220_s4 + $0x180] sm:$0xff] }
  0xbb   :  { %235 = vmatpush.bf16.msrb.mxu2 %v209_v63  ;;  %v387_v63 = vld [vmem:[%s2220_s4 + $0x60] sm:$0xff] }
  0xbc   :  { %v169_v49 = vpop.f32.mrf.mxu1 }
  0xbd   :  { %v208_v24 = vpack.c.bf16 %v169_v49, %v167_v47  ;;  %v402_v47 = vld [vmem:[%s2220_s4 + $0xd8] sm:$0xff] }
  0xbe   :  { %v452_v49 = vpack.c.bf16 %v402_v47, %v400_v46  ;;  %v442_v46 = vpack.c.bf16 %v382_v39, %v380_v38  ;;  %v466_v47 = vpack.c.bf16 %v430_v43, %v428_v40  ;;  %v456_v38 = vpack.c.bf16 %v410_v35, %v408_v32 }
  0xbf   :  { %236 = vmatpush.bf16.msrb.mxu2 %v207_v1 }
  0xc2   :  { %237 = vmatmul.bf16.vlgmr.msrb.gmra.mxu2 %v1452_v6 }
  0xc3   :  { %569 = vmatpush.bf16.msra.mxu2 %v454_v45  ;;  %v377_v45 = vld [vmem:[%s2220_s4 + $0x10] sm:$0xff] }
  0xc4   :  { %v172_v50 = vpop.f32.mrf.mxu1 }
  0xc7   :  { %570 = vmatpush.bf16.msra.mxu2 %v452_v49  ;;  %v425_v49 = vld [vmem:[%s2220_s4 + $0x190] sm:$0xff] }
  0xcc   :  { %v174_v51 = vpop.f32.mrf.mxu1 }
  0xcd   :  { %v210_v21 = vpack.c.bf16 %v174_v51, %v172_v50  ;;  %v395_v50 = vld [vmem:[%s2220_s4 + $0xa0] sm:$0xff]  ;;  %v397_v51 = vld [vmem:[%s2220_s4 + $0xb0] sm:$0xff] }
  0xd2   :  { %242 = vmatmul.bf16.gmra.mxu2 %v1461_v11 }
  0xd4   :  { %v177_v52 = vpop.f32.mrf.mxu1 }
  0xdc   :  { %v179_v53 = vpop.f32.mrf.mxu1 }
  0xdd   :  { %v212_v20 = vpack.c.bf16 %v179_v53, %v177_v52  ;;  %v396_v52 = vld [vmem:[%s2220_s4 + $0xa8] sm:$0xff]  ;;  %v398_v53 = vld [vmem:[%s2220_s4 + $0xb8] sm:$0xff] }
  0xe2   :  { %247 = vmatmul.bf16.gmra.mxu2 %v1470_v18 }
  0xe4   :  { %v182_v54 = vpop.f32.mrf.mxu1 }
  0xec   :  { %v184_v55 = vpop.f32.mrf.mxu1 }
  0xed   :  { %v214_v19 = vpack.c.bf16 %v184_v55, %v182_v54  ;;  %v449_v54 = vpack.c.bf16 %v397_v51, %v395_v50  ;;  %v450_v55 = vpack.c.bf16 %v398_v53, %v396_v52  ;;  %v376_v50 = vld [vmem:[%s2220_s4 + $0x8] sm:$0xff]  ;;  %v378_v51 = vld [vmem:[%s2220_s4 + $0x18] sm:$0xff] }
  0xee   :  { %v424_v52 = vld [vmem:[%s2220_s4 + $0x188] sm:$0xff]  ;;  %v426_v53 = vld [vmem:[%s2220_s4 + $0x198] sm:$0xff] }
  0xef   :  { %473 = vmatpush.bf16.msrb.mxu0 %v449_v54  ;;  %571 = vmatpush.bf16.msra.mxu2 %v450_v55  ;;  %v439_v55 = vpack.c.bf16 %v377_v45, %v375_v44 }
  0xf2   :  { %252 = vmatmul.bf16.gmra.mxu2 %v1479_v25 }
  0xf4   :  { %v187_v57 = vpop.f32.mrf.mxu1 }
  0xfc   :  { %v189_v59 = vpop.f32.mrf.mxu1 }
  0xfd   :  { %v216_v17 = vpack.c.bf16 %v189_v59, %v187_v57  ;;  %v393_v57 = vld [vmem:[%s2220_s4 + $0x90] sm:$0xff]  ;;  %v394_v59 = vld [vmem:[%s2220_s4 + $0x98] sm:$0xff] }
  0xfe   :  { %v447_v60 = vpack.c.bf16 %v393_v57, %v391_v56 }
 0x100   :  { %474 = vmatpush.bf16.msrb.mxu0 %v447_v60  ;;  %v464_v60 = vpack.c.bf16 %v426_v53, %v424_v52 }
 0x102   :  { %257 = vmatmul.bf16.gmra.mxu2 %v1489_v28 }
 0x104   :  { %v192_v61 = vpop.f32.mrf.mxu1 }
 0x10c   :  { %v194_v0 = vpop.f32.mrf.mxu1 }
 0x10d   :  { %v218_v14 = vpack.c.bf16 %v194_v0, %v192_v61  ;;  %v448_v61 = vpack.c.bf16 %v394_v59, %v392_v58  ;;  %v389_v0 = vld [vmem:[%s2220_s4 + $0x70] sm:$0xff]  ;;  %v463_v58 = vpack.c.bf16 %v425_v49, %v423_v48  ;;  %v440_v59 = vpack.c.bf16 %v378_v51, %v376_v50 }
 0x10e   :  { %v445_v1 = vpack.c.bf16 %v389_v0, %v387_v63  ;;  %v419_v0 = vld [vmem:[%s2220_s4 + $0x160] sm:$0xff]  ;;  %v1733_v49 = vperm.slane %v1575_v62, 1 }
 0x10f   :  { %572 = vmatpush.bf16.msra.mxu2 %v448_v61 }
 0x110   :  { %475 = vmatpush.bf16.msrb.mxu0 %v445_v1  ;;  %v421_v1 = vld [vmem:[%s2220_s4 + $0x170] sm:$0xff] }
 0x112   :  { %262 = vmatmul.bf16.gmra.mxu2 %v1499_v31 }
 0x114   :  { %v197_v2 = vpop.f32.mrf.mxu1 }
 0x11c   :  { %v199_v5 = vpop.f32.mrf.mxu1 }
 0x11d   :  { %v220_v13 = vpack.c.bf16 %v199_v5, %v197_v2  ;;  %v435_v2 = vld [vmem:[%s2220_s4 + $0x1e0] sm:$0xff] }
 0x11e   :  { %v469_v5 = vpack.c.bf16 %v437_v3, %v435_v2  ;;  %v420_v2 = vld [vmem:[%s2220_s4 + $0x168] sm:$0xff]  ;;  %v461_v3 = vpack.c.bf16 %v421_v1, %v419_v0 }
 0x120   :  { %520 = vmatpush.bf16.msra.mxu1 %v469_v5 }
 0x122   :  { %267 = vmatmul.bf16.gmra.mxu2 %v1509_v34 }
 0x124   :  { %v202_v7 = vpop.f32.mrf.mxu1 }
 0x12c   :  { %v204_v10 = vpop.f32.mrf.mxu1 }
 0x12d   :  { %v222_v12 = vpack.c.bf16 %v204_v10, %v202_v7  ;;  %v390_v7 = vld [vmem:[%s2220_s4 + $0x78] sm:$0xff] }
 0x12f   :  { %278 = vmatpush.bf16.msrb.mxu3 %v222_v12  ;;  %v446_v12 = vpack.c.bf16 %v390_v7, %v388_v4  ;;  %v422_v4 = vld [vmem:[%s2220_s4 + $0x178] sm:$0xff] }
 0x130   :  { %v462_v5 = vpack.c.bf16 %v422_v4, %v420_v2 }
 0x131   :  { %573 = vmatpush.bf16.msra.mxu2 %v446_v12 }
 0x132   :  { %272 = vmatmul.bf16.gmra.mxu2 %v1519_v37 }
 0x133   :  { %279 = vmatpush.bf16.msrb.mxu3 %v220_v13  ;;  %v470_v13 = vpack.c.bf16 %v438_v9, %v436_v8  ;;  %v415_v8 = vld [vmem:[%s2220_s4 + $0x140] sm:$0xff]  ;;  %v417_v9 = vld [vmem:[%s2220_s4 + $0x150] sm:$0xff] }
 0x134   :  { %v459_v12 = vpack.c.bf16 %v417_v9, %v415_v8 }
 0x137   :  { %280 = vmatpush.bf16.msrb.mxu3 %v218_v14  ;;  %v383_v14 = vld [vmem:[%s2220_s4 + $0x40] sm:$0xff] }
 0x13b   :  { %281 = vmatpush.bf16.msrb.mxu3 %v216_v17  ;;  %v1611_v17 = vperm.slane %v1575_v62, 0 }
 0x13f   :  { %282 = vmatpush.bf16.msrb.mxu3 %v214_v19  ;;  %v443_v19 = vpack.c.bf16 %v385_v15, %v383_v14 }
 0x141   :  { %476 = vmatpush.bf16.msrb.mxu0 %v443_v19  ;;  %v413_v19 = vld [vmem:[%s2220_s4 + $0x130] sm:$0xff] }
 0x143   :  { %283 = vmatpush.bf16.msrb.mxu3 %v212_v20  ;;  %v433_v20 = vld [vmem:[%s2220_s4 + $0x1d0] sm:$0xff] }
 0x144   :  { %v467_v23 = vpack.c.bf16 %v433_v20, %v431_v16  ;;  %v411_v16 = vld [vmem:[%s2220_s4 + $0x120] sm:$0xff]  ;;  %v412_v20 = vld [vmem:[%s2220_s4 + $0x128] sm:$0xff] }
 0x145   :  { %v238_v10 = vpop.f32.mrf.mxu2  ;;  %477 = vmatpush.bf16.msrb.mxu0 %v441_v36 }
 0x146   :  { %v239_v41 = vadd.f32 %v238_v10, %v1611_v17  ;;  %521 = vmatpush.bf16.msra.mxu1 %v467_v23  ;;  %v416_v10 = vld [vmem:[%s2220_s4 + $0x148] sm:$0xff] }
 0x147   :  { %284 = vmatpush.bf16.msrb.mxu3 %v210_v21  ;;  %v384_v21 = vld [vmem:[%s2220_s4 + $0x48] sm:$0xff] }
 0x148   :  { %v327_v56 = vmax.f32 %v239_v41, 0.0 }
 0x149   :  { %478 = vmatpush.bf16.msrb.mxu0 %v439_v55 }
 0x14a   :  { %522 = vmatpush.bf16.msra.mxu1 %v465_v42 }
 0x14b   :  { %285 = vmatpush.bf16.msrb.mxu3 %v208_v24  ;;  %v444_v24 = vpack.c.bf16 %v386_v22, %v384_v21  ;;  %v457_v21 = vpack.c.bf16 %v413_v19, %v411_v16  ;;  %v414_v22 = vld [vmem:[%s2220_s4 + $0x138] sm:$0xff] }
 0x14c   :  { %v458_v23 = vpack.c.bf16 %v414_v22, %v412_v20 }
 0x14d   :  { %574 = vmatpush.bf16.msra.mxu2 %v444_v24  ;;  %v240_v54 = vpop.f32.mrf.mxu2 }
 0x14e   :  { %286 = vmatmul.bf16.vlgmr.msrb.gmra.mxu3 %v1452_v6  ;;  %v241_v57 = vadd.f32 %v240_v54, %v1611_v17  ;;  %523 = vmatpush.bf16.msra.mxu1 %v463_v58 }
 0x14f   :  { %618 = vmatpush.bf16.msra.mxu3 %v470_v13  ;;  %v418_v13 = vld [vmem:[%s2220_s4 + $0x158] sm:$0xff] }
 0x150   :  { %v329_v61 = vmax.f32 %v241_v57, 0.0  ;;  %v460_v14 = vpack.c.bf16 %v418_v13, %v416_v10 }
 0x151   :  { %575 = vmatpush.bf16.msra.mxu2 %v442_v46 }
 0x152   :  { %v359_v63 = vpack.c.bf16 %v329_v61, %v327_v56  ;;  %524 = vmatpush.bf16.msra.mxu1 %v461_v3 }
 0x153   :  { %619 = vmatpush.bf16.msra.mxu3 %v468_v30  ;;  %v409_v30 = vld [vmem:[%s2220_s4 + $0x110] sm:$0xff] }
 0x154   :  { %479 = vmatmul.bf16.vlgmr.msrb.gmra.mxu0 %v359_v63  ;;  %v455_v33 = vpack.c.bf16 %v409_v30, %v407_v29 }
 0x155   :  { %576 = vmatpush.bf16.msra.mxu2 %v440_v59  ;;  %v243_v7 = vpop.f32.mrf.mxu2 }
 0x156   :  { %v244_v15 = vadd.f32 %v243_v7, %v1611_v17  ;;  %525 = vmatpush.bf16.msra.mxu1 %v459_v12 }
 0x157   :  { %620 = vmatpush.bf16.msra.mxu3 %v466_v47 }
 0x158   :  { %577 = vmatmul.bf16.vlgmr.msra.gmra.mxu2 %v359_v63  ;;  %v331_v26 = vmax.f32 %v244_v15, 0.0 }
 0x15a   :  { %526 = vmatpush.bf16.msra.mxu1 %v457_v21 }
 0x15b   :  { %621 = vmatpush.bf16.msra.mxu3 %v464_v60 }
 0x15d   :  { %v245_v24 = vpop.f32.mrf.mxu2 }
 0x15e   :  { %291 = vmatmul.bf16.gmra.mxu3 %v1461_v11  ;;  %v246_v27 = vadd.f32 %v245_v24, %v1611_v17  ;;  %527 = vmatpush.bf16.msra.mxu1 %v455_v33 }
 0x15f   :  { %622 = vmatpush.bf16.msra.mxu3 %v462_v5 }
 0x160   :  { %v333_v36 = vmax.f32 %v246_v27, 0.0 }
 0x162   :  { %v361_v39 = vpack.c.bf16 %v333_v36, %v331_v26 }
 0x163   :  { %623 = vmatpush.bf16.msra.mxu3 %v460_v14 }
 0x164   :  { %484 = vmatmul.bf16.gmra.mxu0 %v361_v39 }
 0x165   :  { %v248_v40 = vpop.f32.mrf.mxu2 }
 0x166   :  { %v249_v41 = vadd.f32 %v248_v40, %v1611_v17 }
 0x167   :  { %624 = vmatpush.bf16.msra.mxu3 %v458_v23 }
 0x168   :  { %582 = vmatmul.bf16.gmra.mxu2 %v361_v39  ;;  %v335_v43 = vmax.f32 %v249_v41, 0.0 }
 0x16b   :  { %625 = vmatpush.bf16.msra.mxu3 %v456_v38 }
 0x16d   :  { %v250_v42 = vpop.f32.mrf.mxu2 }
 0x16e   :  { %296 = vmatmul.bf16.gmra.mxu3 %v1470_v18  ;;  %v251_v44 = vadd.f32 %v250_v42, %v1611_v17 }
 0x170   :  { %v337_v45 = vmax.f32 %v251_v44, 0.0 }
 0x172   :  { %v363_v46 = vpack.c.bf16 %v337_v45, %v335_v43 }
 0x174   :  { %489 = vmatmul.bf16.gmra.mxu0 %v363_v46 }
 0x175   :  { %v253_v48 = vpop.f32.mrf.mxu2 }
 0x176   :  { %v254_v50 = vadd.f32 %v253_v48, %v1611_v17 }
 0x178   :  { %587 = vmatmul.bf16.gmra.mxu2 %v363_v46  ;;  %v339_v55 = vmax.f32 %v254_v50, 0.0 }
 0x17d   :  { %v255_v53 = vpop.f32.mrf.mxu2 }
 0x17e   :  { %301 = vmatmul.bf16.gmra.mxu3 %v1479_v25  ;;  %v256_v56 = vadd.f32 %v255_v53, %v1611_v17 }
 0x180   :  { %v341_v59 = vmax.f32 %v256_v56, 0.0 }
 0x182   :  { %v365_v61 = vpack.c.bf16 %v341_v59, %v339_v55 }
 0x184   :  { %494 = vmatmul.bf16.gmra.mxu0 %v365_v61 }
 0x185   :  { %v258_v63 = vpop.f32.mrf.mxu2 }
 0x186   :  { %v259_v0 = vadd.f32 %v258_v63, %v1611_v17 }
 0x188   :  { %592 = vmatmul.bf16.gmra.mxu2 %v365_v61  ;;  %v343_v5 = vmax.f32 %v259_v0, 0.0 }
 0x18d   :  { %v260_v3 = vpop.f32.mrf.mxu2 }
 0x18e   :  { %306 = vmatmul.bf16.gmra.mxu3 %v1489_v28  ;;  %v261_v7 = vadd.f32 %v260_v3, %v1611_v17 }
 0x190   :  { %v345_v10 = vmax.f32 %v261_v7, 0.0 }
 0x192   :  { %v367_v13 = vpack.c.bf16 %v345_v10, %v343_v5 }
 0x194   :  { %499 = vmatmul.bf16.gmra.mxu0 %v367_v13 }
 0x195   :  { %v263_v15 = vpop.f32.mrf.mxu2 }
 0x196   :  { %v264_v16 = vadd.f32 %v263_v15, %v1611_v17 }
 0x198   :  { %597 = vmatmul.bf16.gmra.mxu2 %v367_v13  ;;  %v347_v23 = vmax.f32 %v264_v16, 0.0 }
 0x19d   :  { %v265_v21 = vpop.f32.mrf.mxu2 }
 0x19e   :  { %311 = vmatmul.bf16.gmra.mxu3 %v1499_v31  ;;  %v266_v24 = vadd.f32 %v265_v21, %v1611_v17 }
 0x1a0   :  { %v349_v29 = vmax.f32 %v266_v24, 0.0 }
 0x1a2   :  { %v369_v32 = vpack.c.bf16 %v349_v29, %v347_v23 }
 0x1a4   :  { %504 = vmatmul.bf16.gmra.mxu0 %v369_v32 }
 0x1a5   :  { %v268_v35 = vpop.f32.mrf.mxu2 }
 0x1a6   :  { %v269_v36 = vadd.f32 %v268_v35, %v1611_v17 }
 0x1a8   :  { %602 = vmatmul.bf16.gmra.mxu2 %v369_v32  ;;  %v351_v42 = vmax.f32 %v269_v36, 0.0 }
 0x1ad   :  { %v270_v40 = vpop.f32.mrf.mxu2 }
 0x1ae   :  { %316 = vmatmul.bf16.gmra.mxu3 %v1509_v34  ;;  %v271_v43 = vadd.f32 %v270_v40, %v1611_v17 }
 0x1b0   :  { %v353_v46 = vmax.f32 %v271_v43, 0.0 }
 0x1b2   :  { %v371_v48 = vpack.c.bf16 %v353_v46, %v351_v42 }
 0x1b4   :  { %509 = vmatmul.bf16.gmra.mxu0 %v371_v48 }
 0x1b8   :  { %607 = vmatmul.bf16.gmra.mxu2 %v371_v48 }
 0x1be   :  { %321 = vmatmul.bf16.gmra.mxu3 %v1519_v37 }
 0x1d1   :  { %v287_v47 = vpop.f32.mrf.mxu3  ;;  %v480_v15 = vpop.f32.mrf.mxu0 }
 0x1d2   :  { %v288_v51 = vadd.f32 %v287_v47, %v1733_v49 }
 0x1d4   :  { %v328_v57 = vmax.f32 %v288_v51, 0.0  ;;  %v273_v51 = vpop.f32.mrf.mxu2 }
 0x1d9   :  { %v289_v52 = vpop.f32.mrf.mxu3 }
 0x1da   :  { %v290_v54 = vadd.f32 %v289_v52, %v1733_v49  ;;  %v274_v52 = vadd.f32 %v273_v51, %v1611_v17 }
 0x1dc   :  { %v330_v58 = vmax.f32 %v290_v54, 0.0  ;;  %v275_v55 = vpop.f32.mrf.mxu2 }
 0x1de   :  { %v360_v60 = vpack.c.bf16 %v330_v58, %v328_v57  ;;  %v355_v57 = vmax.f32 %v274_v52, 0.0  ;;  %v276_v58 = vadd.f32 %v275_v55, %v1611_v17 }
 0x1e0   :  { %528 = vmatmul.bf16.vlgmr.msra.gmra.mxu1 %v360_v60  ;;  %626 = vmatmul.bf16.vlgmr.msra.gmra.mxu3 %v360_v60  ;;  %v357_v61 = vmax.f32 %v276_v58, 0.0 }
 0x1e1   :  { %v292_v62 = vpop.f32.mrf.mxu3 }
 0x1e2   :  { %v293_v1 = vadd.f32 %v292_v62, %v1733_v49  ;;  %v373_v63 = vpack.c.bf16 %v357_v61, %v355_v57 }
 0x1e4   :  { %v332_v8 = vmax.f32 %v293_v1, 0.0  ;;  %514 = vmatmul.bf16.gmra.mxu0 %v373_v63  ;;  %612 = vmatmul.bf16.gmra.mxu2 %v373_v63 }
 0x1e9   :  { %v294_v2 = vpop.f32.mrf.mxu3 }
 0x1ea   :  { %v295_v4 = vadd.f32 %v294_v2, %v1733_v49 }
 0x1ec   :  { %v334_v9 = vmax.f32 %v295_v4, 0.0 }
 0x1ee   :  { %v362_v12 = vpack.c.bf16 %v334_v9, %v332_v8 }
 0x1f0   :  { %533 = vmatmul.bf16.gmra.mxu1 %v362_v12  ;;  %631 = vmatmul.bf16.gmra.mxu3 %v362_v12 }
 0x1f1   :  { %v297_v14 = vpop.f32.mrf.mxu3 }
 0x1f2   :  { %v298_v19 = vadd.f32 %v297_v14, %v1733_v49 }
 0x1f4   :  { %v336_v26 = vmax.f32 %v298_v19, 0.0  ;;  %v578_v19 = vpop.f32.mrf.mxu2 }
 0x1f9   :  { %v299_v20 = vpop.f32.mrf.mxu3 }
 0x1fa   :  { %v300_v22 = vadd.f32 %v299_v20, %v1733_v49 }
 0x1fc   :  { %v338_v27 = vmax.f32 %v300_v22, 0.0  ;;  %v1760_v22 = vpop.f32.mrf.mxu0  ;;  %v1763_v29 = vpop.f32.mrf.mxu2 }
 0x1fd   :  { %2250 = vst [vmem:[#allocation10_spill] sm:$0xff] %v1763_v29 }
 0x1fe   :  { %v364_v30 = vpack.c.bf16 %v338_v27, %v336_v26 }
 0x200   :  { %538 = vmatmul.bf16.gmra.mxu1 %v364_v30  ;;  %636 = vmatmul.bf16.gmra.mxu3 %v364_v30 }
 0x201   :  { %v302_v33 = vpop.f32.mrf.mxu3 }
 0x202   :  { %v303_v38 = vadd.f32 %v302_v33, %v1733_v49 }
 0x204   :  { %v340_v44 = vmax.f32 %v303_v38, 0.0  ;;  %v485_v30 = vpop.f32.mrf.mxu0  ;;  %v583_v32 = vpop.f32.mrf.mxu2 }
 0x209   :  { %v304_v39 = vpop.f32.mrf.mxu3 }
 0x20a   :  { %v305_v41 = vadd.f32 %v304_v39, %v1733_v49 }
 0x20c   :  { %v342_v45 = vmax.f32 %v305_v41, 0.0  ;;  %v1765_v35 = vpop.f32.mrf.mxu0  ;;  %v1769_v39 = vpop.f32.mrf.mxu2 }
 0x20e   :  { %v366_v47 = vpack.c.bf16 %v342_v45, %v340_v44 }
 0x210   :  { %543 = vmatmul.bf16.gmra.mxu1 %v366_v47  ;;  %641 = vmatmul.bf16.gmra.mxu3 %v366_v47 }
 0x211   :  { %v307_v50 = vpop.f32.mrf.mxu3 }
 0x212   :  { %v308_v53 = vadd.f32 %v307_v50, %v1733_v49 }
 0x214   :  { %v344_v59 = vmax.f32 %v308_v53, 0.0  ;;  %v490_v41 = vpop.f32.mrf.mxu0  ;;  %v588_v44 = vpop.f32.mrf.mxu2 }
 0x219   :  { %v309_v54 = vpop.f32.mrf.mxu3 }
 0x21a   :  { %v310_v56 = vadd.f32 %v309_v54, %v1733_v49 }
 0x21c   :  { %v346_v60 = vmax.f32 %v310_v56, 0.0  ;;  %v1779_v46 = vpop.f32.mrf.mxu0  ;;  %v1785_v51 = vpop.f32.mrf.mxu2 }
 0x21e   :  { %v368_v62 = vpack.c.bf16 %v346_v60, %v344_v59 }
 0x220   :  { %548 = vmatmul.bf16.gmra.mxu1 %v368_v62  ;;  %646 = vmatmul.bf16.gmra.mxu3 %v368_v62 }
 0x221   :  { %v312_v0 = vpop.f32.mrf.mxu3 }
 0x222   :  { %v313_v1 = vadd.f32 %v312_v0, %v1733_v49 }
 0x224   :  { %v348_v4 = vmax.f32 %v313_v1, 0.0  ;;  %v495_v53 = vpop.f32.mrf.mxu0  ;;  %v593_v56 = vpop.f32.mrf.mxu2 }
 0x229   :  { %v314_v2 = vpop.f32.mrf.mxu3 }
 0x22a   :  { %v315_v3 = vadd.f32 %v314_v2, %v1733_v49 }
 0x22c   :  { %v350_v5 = vmax.f32 %v315_v3, 0.0  ;;  %v1793_v59 = vpop.f32.mrf.mxu0  ;;  %v1797_v61 = vpop.f32.mrf.mxu2 }
 0x22e   :  { %v370_v7 = vpack.c.bf16 %v350_v5, %v348_v4 }
 0x230   :  { %553 = vmatmul.bf16.gmra.mxu1 %v370_v7  ;;  %651 = vmatmul.bf16.gmra.mxu3 %v370_v7 }
 0x231   :  { %v317_v17 = vpop.f32.mrf.mxu3 }
 0x232   :  { %v318_v8 = vadd.f32 %v317_v17, %v1733_v49 }
 0x234   :  { %v352_v12 = vmax.f32 %v318_v8, 0.0  ;;  %v500_v1 = vpop.f32.mrf.mxu0  ;;  %v598_v4 = vpop.f32.mrf.mxu2 }
 0x239   :  { %v319_v9 = vpop.f32.mrf.mxu3 }
 0x23a   :  { %v320_v10 = vadd.f32 %v319_v9, %v1733_v49 }
 0x23c   :  { %v354_v13 = vmax.f32 %v320_v10, 0.0  ;;  %v502_v7 = vpop.f32.mrf.mxu0  ;;  %v600_v10 = vpop.f32.mrf.mxu2 }
 0x23e   :  { %v372_v14 = vpack.c.bf16 %v354_v13, %v352_v12 }
 0x240   :  { %558 = vmatmul.bf16.gmra.mxu1 %v372_v14  ;;  %656 = vmatmul.bf16.gmra.mxu3 %v372_v14 }
 0x241   :  { %v322_v16 = vpop.f32.mrf.mxu3 }
 0x242   :  { %v323_v20 = vadd.f32 %v322_v16, %v1733_v49 }
 0x244   :  { %v356_v24 = vmax.f32 %v323_v20, 0.0  ;;  %v505_v12 = vpop.f32.mrf.mxu0  ;;  %v603_v16 = vpop.f32.mrf.mxu2 }
 0x249   :  { %v324_v21 = vpop.f32.mrf.mxu3 }
 0x24a   :  { %v325_v23 = vadd.f32 %v324_v21, %v1733_v49 }
 0x24c   :  { %v358_v26 = vmax.f32 %v325_v23, 0.0  ;;  %v507_v20 = vpop.f32.mrf.mxu0  ;;  %v605_v23 = vpop.f32.mrf.mxu2 }
 0x24e   :  { %v374_v27 = vpack.c.bf16 %v358_v26, %v356_v24 }
 0x250   :  { %563 = vmatmul.bf16.gmra.mxu1 %v374_v27  ;;  %661 = vmatmul.bf16.gmra.mxu3 %v374_v27 }
 0x254   :  { %v510_v27 = vpop.f32.mrf.mxu0 }
 0x25d   :  { %v529_v33 = vpop.f32.mrf.mxu1 }
 0x25e   :  { %v1767_v36 = vadd.f32 %v529_v33, %v480_v15 }
 0x260   :  { %2251 = vst [vmem:[#allocation11_spill] sm:$0xff] %v1767_v36 }
 0x263   :  { %v627_v38 = vpop.f32.mrf.mxu3 }
 0x264   :  { %v1771_v40 = vadd.f32 %v627_v38, %v578_v19  ;;  %v512_v38 = vpop.f32.mrf.mxu0 }
 0x265   :  { %v1773_v49 = vpop.f32.mrf.mxu1 }
 0x266   :  { %2252 = vst [vmem:[#allocation12_spill] sm:$0xff] %v1771_v40 }
 0x26b   :  { %v1775_v42 = vpop.f32.mrf.mxu3 }
 0x26c   :  { %2253 = vst [vmem:[#allocation13_spill] sm:$0xff] %v1775_v42 }
 0x26d   :  { %v534_v43 = vpop.f32.mrf.mxu1 }
 0x26e   :  { %v1777_v45 = vadd.f32 %v534_v43, %v485_v30 }
 0x273   :  { %v632_v47 = vpop.f32.mrf.mxu3 }
 0x274   :  { %v1781_v48 = vadd.f32 %v632_v47, %v583_v32  ;;  %v608_v32 = vpop.f32.mrf.mxu2  ;;  %v515_v47 = vpop.f32.mrf.mxu0 }
 0x275   :  { %v1783_v50 = vpop.f32.mrf.mxu1 }
 0x276   :  { %2254 = vst [vmem:[#allocation14_spill] sm:$0xff] %v1781_v48 }
 0x27b   :  { %v1787_v52 = vpop.f32.mrf.mxu3 }
 0x27d   :  { %v539_v54 = vpop.f32.mrf.mxu1 }
 0x27e   :  { %v1789_v55 = vadd.f32 %v539_v54, %v490_v41 }
 0x283   :  { %v637_v57 = vpop.f32.mrf.mxu3 }
 0x284   :  { %v1791_v58 = vadd.f32 %v637_v57, %v588_v44  ;;  %v610_v44 = vpop.f32.mrf.mxu2 }
 0x285   :  { %v1795_v60 = vpop.f32.mrf.mxu1 }
 0x28b   :  { %v1799_v62 = vpop.f32.mrf.mxu3 }
 0x28d   :  { %v544_v63 = vpop.f32.mrf.mxu1 }
 0x28e   :  { %v1801_v0 = vadd.f32 %v544_v63, %v495_v53  ;;  %v517_v63 = vpop.f32.mrf.mxu0 }
 0x293   :  { %v642_v2 = vpop.f32.mrf.mxu3 }
 0x294   :  { %v1803_v3 = vadd.f32 %v642_v2, %v593_v56  ;;  %v613_v56 = vpop.f32.mrf.mxu2 }
 0x295   :  { %v546_v5 = vpop.f32.mrf.mxu1 }
 0x29b   :  { %v1805_v17 = vpop.f32.mrf.mxu3 }
 0x29c   :  { %v615_v34 = vpop.f32.mrf.mxu2 }
 0x29d   :  { %v549_v8 = vpop.f32.mrf.mxu1 }
 0x29e   :  { %v550_v9 = vadd.f32 %v549_v8, %v500_v1 }
 0x2a3   :  { %v647_v13 = vpop.f32.mrf.mxu3 }
 0x2a4   :  { %v648_v14 = vadd.f32 %v647_v13, %v598_v4 }
 0x2a5   :  { %v551_v15 = vpop.f32.mrf.mxu1 }
 0x2a6   :  { %v552_v42 = vadd.f32 %v551_v15, %v502_v7  ;;  %v848_v7 = vld [vmem:[%s2222_s6 + $0x68] sm:$0xff] }
 0x2ab   :  { %v649_v19 = vpop.f32.mrf.mxu3 }
 0x2ad   :  { %v554_v21 = vpop.f32.mrf.mxu1 }
 0x2ae   :  { %v555_v40 = vadd.f32 %v554_v21, %v505_v12  ;;  %v866_v12 = vld [vmem:[%s2222_s6 + $0xf8] sm:$0xff]  ;;  %v863_v21 = vld [vmem:[%s2222_s6 + $0xe0] sm:$0xff] }
 0x2b3   :  { %v652_v24 = vpop.f32.mrf.mxu3 }
 0x2b5   :  { %v556_v26 = vpop.f32.mrf.mxu1 }
 0x2b6   :  { %v557_v28 = vadd.f32 %v556_v26, %v507_v20  ;;  %v650_v20 = vadd.f32 %v649_v19, %v600_v10  ;;  %v865_v10 = vld [vmem:[%s2222_s6 + $0xf0] sm:$0xff]  ;;  %v843_v26 = vld [vmem:[%s2222_s6 + $0x40] sm:$0xff] }
 0x2b7   :  { %v882_v15 = vpack.c.bf16 %v866_v12, %v865_v10 }
 0x2b8   :  { %v677_v29 = vpack.c.bf16 %v557_v28, %v555_v40 }
 0x2b9   :  { %932 = vmatpush.bf16.msrb.mxu3 %v882_v15 }
 0x2bb   :  { %v654_v30 = vpop.f32.mrf.mxu3 }
 0x2bd   :  { %v559_v33 = vpop.f32.mrf.mxu1 }
 0x2be   :  { %v560_v37 = vadd.f32 %v559_v33, %v510_v27  ;;  %v547_v27 = vadd.f32 %v546_v5, %v1793_v59  ;;  %v675_v33 = vpack.c.bf16 %v552_v42, %v550_v9  ;;  %v635_v42 = vadd.f32 %v1787_v52, %v1769_v39  ;;  %v2258_v59 = vld [vmem:[#allocation14_spill] sm:$0xff]  ;;  %v2261_v39 = vld [vmem:[#allocation3_spill] sm:$0xff]  ;;  %v2262_v52 = vld [vmem:[#allocation4_spill] sm:$0xff] }
 0x2bf   :  { %v847_v5 = vld [vmem:[%s2222_s6 + $0x60] sm:$0xff]  ;;  %v2265_v9 = vld [vmem:[#allocation7_spill] sm:$0xff] }
 0x2c3   :  { %v657_v41 = vpop.f32.mrf.mxu3 }
 0x2c4   :  { %v658_v36 = vadd.f32 %v657_v41, %v608_v32  ;;  %v861_v32 = vld [vmem:[%s2222_s6 + $0xd0] sm:$0xff] }
 0x2c5   :  { %v561_v43 = vpop.f32.mrf.mxu1 }
 0x2c6   :  { %v562_v8 = vadd.f32 %v561_v43, %v512_v38  ;;  %v653_v38 = vadd.f32 %v652_v24, %v603_v16  ;;  %v846_v16 = vld [vmem:[%s2222_s6 + $0x58] sm:$0xff] }
 0x2c7   :  { %v862_v43 = vld [vmem:[%s2222_s6 + $0xd8] sm:$0xff] }
 0x2c8   :  { %v679_v25 = vpack.c.bf16 %v562_v8, %v560_v37  ;;  %v840_v8 = vld [vmem:[%s2222_s6 + $0x28] sm:$0xff] }
 0x2cb   :  { %v659_v53 = vpop.f32.mrf.mxu3 }
 0x2cc   :  { %v660_v6 = vadd.f32 %v659_v53, %v610_v44  ;;  %v880_v44 = vpack.c.bf16 %v862_v43, %v861_v32  ;;  %v841_v53 = vld [vmem:[%s2222_s6 + $0x30] sm:$0xff] }
 0x2cd   :  { %v564_v54 = vpop.f32.mrf.mxu1 }
 0x2ce   :  { %v565_v2 = vadd.f32 %v564_v54, %v515_v47  ;;  %v655_v47 = vadd.f32 %v654_v30, %v605_v23  ;;  %v680_v54 = vpack.c.bf16 %v660_v6, %v658_v36  ;;  %v537_v6 = vadd.f32 %v1783_v50, %v1765_v35  ;;  %v2256_v50 = vld [vmem:[#allocation10_spill] sm:$0xff]  ;;  %v864_v23 = vld [vmem:[%s2222_s6 + $0xe8] sm:$0xff] }
 0x2cf   :  { %v532_v36 = vadd.f32 %v1773_v49, %v1760_v22  ;;  %v2259_v22 = vld [vmem:[#allocation2_spill] sm:$0xff]  ;;  %v2260_v49 = vld [vmem:[#allocation12_spill] sm:$0xff]  ;;  %v881_v24 = vpack.c.bf16 %v864_v23, %v863_v21  ;;  %v844_v30 = vld [vmem:[%s2222_s6 + $0x48] sm:$0xff] }
 0x2d0   :  { %v678_v37 = vpack.c.bf16 %v655_v47, %v653_v38  ;;  %v669_v40 = vpack.c.bf16 %v537_v6, %v1777_v45  ;;  %v871_v41 = vpack.c.bf16 %v844_v30, %v843_v26  ;;  %v2266_v47 = vld [vmem:[#allocation8_spill] sm:$0xff]  ;;  %v836_v6 = vld [vmem:[%s2222_s6 + $0x8] sm:$0xff] }
 0x2d1   :  { %933 = vmatpush.bf16.msrb.mxu3 %v881_v24  ;;  %v837_v38 = vld [vmem:[%s2222_s6 + $0x10] sm:$0xff] }
 0x2d3   :  { %v662_v57 = vpop.f32.mrf.mxu3 }
 0x2d4   :  { %v663_v18 = vadd.f32 %v662_v57, %v613_v56  ;;  %v842_v56 = vld [vmem:[%s2222_s6 + $0x38] sm:$0xff] }
 0x2d5   :  { %v566_v1 = vpop.f32.mrf.mxu1  ;;  %934 = vmatpush.bf16.msrb.mxu3 %v880_v44  ;;  %v870_v57 = vpack.c.bf16 %v842_v56, %v841_v53 }
 0x2d6   :  { %v567_v4 = vadd.f32 %v566_v1, %v517_v63  ;;  %v859_v63 = vld [vmem:[%s2222_s6 + $0xc0] sm:$0xff]  ;;  %v860_v1 = vld [vmem:[%s2222_s6 + $0xc8] sm:$0xff] }
 0x2d8   :  { %v681_v13 = vpack.c.bf16 %v567_v4, %v565_v2  ;;  %v879_v2 = vpack.c.bf16 %v860_v1, %v859_v63  ;;  %v839_v4 = vld [vmem:[%s2222_s6 + $0x20] sm:$0xff] }
 0x2da   :  { %689 = vmatpush.bf16.msra.mxu0 %v681_v13  ;;  %935 = vmatpush.bf16.msrb.mxu3 %v879_v2  ;;  %v869_v13 = vpack.c.bf16 %v840_v8, %v839_v4 }
 0x2db   :  { %v664_v31 = vpop.f32.mrf.mxu3 }
 0x2dc   :  { %v665_v11 = vadd.f32 %v664_v31, %v615_v34  ;;  %v542_v31 = vadd.f32 %v1795_v60, %v1779_v46  ;;  %v640_v34 = vadd.f32 %v1799_v62, %v1785_v51  ;;  %v2255_v46 = vld [vmem:[#allocation11_spill] sm:$0xff]  ;;  %v2257_v51 = vld [vmem:[#allocation13_spill] sm:$0xff]  ;;  %v670_v60 = vpack.c.bf16 %v635_v42, %v2258_v59  ;;  %v849_v62 = vld [vmem:[%s2222_s6 + $0x70] sm:$0xff] }
 0x2dd   :  { %v852_v42 = vld [vmem:[%s2222_s6 + $0x88] sm:$0xff] }
 0x2de   :  { %v682_v48 = vpack.c.bf16 %v665_v11, %v663_v18  ;;  %690 = vmatpush.bf16.msra.mxu0 %v679_v25  ;;  %v673_v11 = vpack.c.bf16 %v547_v27, %v1801_v0  ;;  %v645_v18 = vadd.f32 %v1805_v17, %v1797_v61  ;;  %v676_v25 = vpack.c.bf16 %v650_v20, %v648_v14  ;;  %v2264_v61 = vld [vmem:[#allocation6_spill] sm:$0xff]  ;;  %v850_v0 = vld [vmem:[%s2222_s6 + $0x78] sm:$0xff]  ;;  %v845_v14 = vld [vmem:[%s2222_s6 + $0x50] sm:$0xff] }
 0x2df   :  { %v671_v28 = vpack.c.bf16 %v542_v31, %v1789_v55  ;;  %v672_v35 = vpack.c.bf16 %v640_v34, %v1791_v58  ;;  %v630_v55 = vadd.f32 %v2257_v51, %v2256_v50  ;;  %v2263_v58 = vld [vmem:[#allocation5_spill] sm:$0xff]  ;;  %v873_v17 = vpack.c.bf16 %v848_v7, %v847_v5  ;;  %v855_v31 = vld [vmem:[%s2222_s6 + $0xa0] sm:$0xff]  ;;  %v853_v34 = vld [vmem:[%s2222_s6 + $0x90] sm:$0xff] }
 0x2e0   :  { %738 = vmatpush.bf16.msrb.mxu1 %v682_v48  ;;  %v667_v48 = vpack.c.bf16 %v532_v36, %v2255_v46  ;;  %v872_v19 = vpack.c.bf16 %v846_v16, %v845_v14  ;;  %v858_v27 = vld [vmem:[%s2222_s6 + $0xb8] sm:$0xff] }
 0x2e1   :  { %v668_v45 = vpack.c.bf16 %v630_v55, %v2260_v49  ;;  %v838_v20 = vld [vmem:[%s2222_s6 + $0x18] sm:$0xff] }
 0x2e2   :  { %691 = vmatpush.bf16.msra.mxu0 %v677_v29  ;;  %v674_v29 = vpack.c.bf16 %v645_v18, %v1803_v3  ;;  %v874_v3 = vpack.c.bf16 %v850_v0, %v849_v62  ;;  %v2267_v46 = vld [vmem:[#allocation9_spill] sm:$0xff] }
 0x2e4   :  { %739 = vmatpush.bf16.msrb.mxu1 %v680_v54  ;;  %883 = vmatpush.bf16.msrb.mxu2 %v874_v3  ;;  %v857_v54 = vld [vmem:[%s2222_s6 + $0xb0] sm:$0xff] }
 0x2e6   :  { %692 = vmatpush.bf16.msra.mxu0 %v675_v33  ;;  %v878_v33 = vpack.c.bf16 %v858_v27, %v857_v54 }
 0x2e8   :  { %740 = vmatpush.bf16.msrb.mxu1 %v678_v37  ;;  %884 = vmatpush.bf16.msrb.mxu2 %v873_v17  ;;  %v868_v37 = vpack.c.bf16 %v838_v20, %v837_v38 }
 0x2e9   :  { %936 = vmatpush.bf16.msrb.mxu3 %v878_v33 }
 0x2ea   :  { %693 = vmatpush.bf16.msra.mxu0 %v673_v11  ;;  %v856_v11 = vld [vmem:[%s2222_s6 + $0xa8] sm:$0xff] }
 0x2eb   :  { %v877_v18 = vpack.c.bf16 %v856_v11, %v855_v31 }
 0x2ec   :  { %741 = vmatpush.bf16.msrb.mxu1 %v676_v25  ;;  %885 = vmatpush.bf16.msrb.mxu2 %v872_v19  ;;  %v835_v25 = vld [vmem:[%s2222_s6] sm:$0xff] }
 0x2ed   :  { %937 = vmatpush.bf16.msrb.mxu3 %v877_v18 }
 0x2ee   :  { %694 = vmatpush.bf16.msra.mxu0 %v671_v28  ;;  %v867_v28 = vpack.c.bf16 %v836_v6, %v835_v25 }
 0x2f0   :  { %742 = vmatpush.bf16.msrb.mxu1 %v674_v29  ;;  %886 = vmatpush.bf16.msrb.mxu2 %v871_v41  ;;  %v854_v29 = vld [vmem:[%s2222_s6 + $0x98] sm:$0xff] }
 0x2f1   :  { %v876_v36 = vpack.c.bf16 %v854_v29, %v853_v34 }
 0x2f2   :  { %695 = vmatpush.bf16.msra.mxu0 %v669_v40  ;;  %v851_v40 = vld [vmem:[%s2222_s6 + $0x80] sm:$0xff] }
 0x2f3   :  { %938 = vmatpush.bf16.msrb.mxu3 %v876_v36 }
 0x2f4   :  { %743 = vmatpush.bf16.msrb.mxu1 %v672_v35  ;;  %887 = vmatpush.bf16.msrb.mxu2 %v870_v57  ;;  %v875_v35 = vpack.c.bf16 %v852_v42, %v851_v40 }
 0x2f6   :  { %696 = vmatpush.bf16.msra.mxu0 %v667_v48  ;;  %v683_v48 = vld [vmem:[%s2223_s5] sm:$0x3] }
 0x2f7   :  { %939 = vmatpush.bf16.msrb.mxu3 %v875_v35  ;;  %v1945_v51 = vperm.slane %v683_v48, 0  ;;  %v1948_v49 = vperm.slane %v683_v48, 1 }
 0x2f8   :  { %744 = vmatpush.bf16.msrb.mxu1 %v670_v60  ;;  %888 = vmatpush.bf16.msrb.mxu2 %v869_v13 }
 0x2f9   :  { %697 = vmatmul.bf16.vlgmr.msra.gmra.mxu0 %v2259_v22 }
 0x2fc   :  { %745 = vmatpush.bf16.msrb.mxu1 %v668_v45  ;;  %889 = vmatpush.bf16.msrb.mxu2 %v868_v37 }
 0x2ff   :  { %746 = vmatmul.bf16.vlgmr.msrb.gmra.mxu1 %v2259_v22 }
 0x300   :  { %890 = vmatpush.bf16.msrb.mxu2 %v867_v28 }
 0x309   :  { %702 = vmatmul.bf16.gmra.mxu0 %v2261_v39 }
 0x30f   :  { %751 = vmatmul.bf16.gmra.mxu1 %v2261_v39 }
 0x319   :  { %707 = vmatmul.bf16.gmra.mxu0 %v2262_v52 }
 0x31f   :  { %756 = vmatmul.bf16.gmra.mxu1 %v2262_v52 }
 0x329   :  { %712 = vmatmul.bf16.gmra.mxu0 %v2263_v58 }
 0x32f   :  { %761 = vmatmul.bf16.gmra.mxu1 %v2263_v58 }
 0x339   :  { %717 = vmatmul.bf16.gmra.mxu0 %v2264_v61 }
 0x33f   :  { %766 = vmatmul.bf16.gmra.mxu1 %v2264_v61 }
 0x349   :  { %722 = vmatmul.bf16.gmra.mxu0 %v2265_v9 }
 0x34f   :  { %771 = vmatmul.bf16.gmra.mxu1 %v2265_v9 }
 0x359   :  { %727 = vmatmul.bf16.gmra.mxu0 %v2266_v47 }
 0x35f   :  { %776 = vmatmul.bf16.gmra.mxu1 %v2266_v47 }
 0x369   :  { %732 = vmatmul.bf16.gmra.mxu0 %v2267_v46 }
 0x36f   :  { %781 = vmatmul.bf16.gmra.mxu1 %v2267_v46 }
 0x376   :  { %v698_v50 = vpop.f32.mrf.mxu0 }
 0x377   :  { %v699_v59 = vadd.f32 %v698_v50, %v1945_v51 }
 0x379   :  { %v787_v62 = vmax.f32 %v699_v59, 0.0 }
 0x37c   :  { %v747_v55 = vpop.f32.mrf.mxu1 }
 0x37d   :  { %v748_v3 = vadd.f32 %v747_v55, %v1948_v49 }
 0x37e   :  { %v700_v60 = vpop.f32.mrf.mxu0 }
 0x37f   :  { %v701_v45 = vadd.f32 %v700_v60, %v1945_v51  ;;  %v788_v12 = vmax.f32 %v748_v3, 0.0 }
 0x381   :  { %v789_v0 = vmax.f32 %v701_v45, 0.0 }
 0x383   :  { %v819_v5 = vpack.c.bf16 %v789_v0, %v787_v62 }
 0x384   :  { %v749_v7 = vpop.f32.mrf.mxu1 }
 0x385   :  { %v750_v17 = vadd.f32 %v749_v7, %v1948_v49  ;;  %891 = vmatmul.bf16.vlgmr.msrb.gmra.mxu2 %v819_v5 }
 0x386   :  { %v703_v10 = vpop.f32.mrf.mxu0 }
 0x387   :  { %v790_v14 = vmax.f32 %v750_v17, 0.0  ;;  %v704_v19 = vadd.f32 %v703_v10, %v1945_v51 }
 0x389   :  { %v820_v15 = vpack.c.bf16 %v790_v14, %v788_v12  ;;  %v791_v24 = vmax.f32 %v704_v19, 0.0 }
 0x38b   :  { %940 = vmatmul.bf16.vlgmr.msrb.gmra.mxu3 %v820_v15 }
 0x38c   :  { %v752_v16 = vpop.f32.mrf.mxu1 }
 0x38d   :  { %v753_v30 = vadd.f32 %v752_v16, %v1948_v49 }
 0x38e   :  { %v705_v21 = vpop.f32.mrf.mxu0 }
 0x38f   :  { %v706_v23 = vadd.f32 %v705_v21, %v1945_v51  ;;  %v792_v53 = vmax.f32 %v753_v30, 0.0 }
 0x391   :  { %v793_v26 = vmax.f32 %v706_v23, 0.0 }
 0x393   :  { %v821_v32 = vpack.c.bf16 %v793_v26, %v791_v24 }
 0x394   :  { %v754_v41 = vpop.f32.mrf.mxu1 }
 0x395   :  { %v755_v43 = vadd.f32 %v754_v41, %v1948_v49  ;;  %896 = vmatmul.bf16.gmra.mxu2 %v821_v32 }
 0x396   :  { %v708_v44 = vpop.f32.mrf.mxu0 }
 0x397   :  { %v794_v56 = vmax.f32 %v755_v43, 0.0  ;;  %v709_v1 = vadd.f32 %v708_v44, %v1945_v51 }
 0x399   :  { %v822_v57 = vpack.c.bf16 %v794_v56, %v792_v53  ;;  %v795_v8 = vmax.f32 %v709_v1, 0.0 }
 0x39b   :  { %945 = vmatmul.bf16.gmra.mxu3 %v822_v57 }
 0x39c   :  { %v757_v63 = vpop.f32.mrf.mxu1 }
 0x39d   :  { %v758_v54 = vadd.f32 %v757_v63, %v1948_v49 }
 0x39e   :  { %v710_v2 = vpop.f32.mrf.mxu0 }
 0x39f   :  { %v711_v4 = vadd.f32 %v710_v2, %v1945_v51  ;;  %v796_v37 = vmax.f32 %v758_v54, 0.0 }
 0x3a1   :  { %v797_v13 = vmax.f32 %v711_v4, 0.0 }
 0x3a3   :  { %v823_v27 = vpack.c.bf16 %v797_v13, %v795_v8 }
 0x3a4   :  { %v759_v33 = vpop.f32.mrf.mxu1 }
 0x3a5   :  { %v760_v38 = vadd.f32 %v759_v33, %v1948_v49  ;;  %901 = vmatmul.bf16.gmra.mxu2 %v823_v27 }
 0x3a6   :  { %v713_v20 = vpop.f32.mrf.mxu0 }
 0x3a7   :  { %v798_v31 = vmax.f32 %v760_v38, 0.0  ;;  %v714_v25 = vadd.f32 %v713_v20, %v1945_v51 }
 0x3a9   :  { %v824_v11 = vpack.c.bf16 %v798_v31, %v796_v37  ;;  %v799_v34 = vmax.f32 %v714_v25, 0.0 }
 0x3ab   :  { %950 = vmatmul.bf16.gmra.mxu3 %v824_v11 }
 0x3ac   :  { %v762_v18 = vpop.f32.mrf.mxu1 }
 0x3ad   :  { %v763_v36 = vadd.f32 %v762_v18, %v1948_v49 }
 0x3ae   :  { %v715_v6 = vpop.f32.mrf.mxu0 }
 0x3af   :  { %v716_v28 = vadd.f32 %v715_v6, %v1945_v51  ;;  %v800_v50 = vmax.f32 %v763_v36, 0.0 }
 0x3b1   :  { %v801_v29 = vmax.f32 %v716_v28, 0.0 }
 0x3b3   :  { %v825_v40 = vpack.c.bf16 %v801_v29, %v799_v34 }
 0x3b4   :  { %v764_v42 = vpop.f32.mrf.mxu1 }
 0x3b5   :  { %v765_v35 = vadd.f32 %v764_v42, %v1948_v49  ;;  %906 = vmatmul.bf16.gmra.mxu2 %v825_v40 }
 0x3b6   :  { %v718_v48 = vpop.f32.mrf.mxu0 }
 0x3b7   :  { %v802_v55 = vmax.f32 %v765_v35, 0.0  ;;  %v719_v45 = vadd.f32 %v718_v48, %v1945_v51 }
 0x3b9   :  { %v826_v59 = vpack.c.bf16 %v802_v55, %v800_v50  ;;  %v803_v3 = vmax.f32 %v719_v45, 0.0 }
 0x3bb   :  { %955 = vmatmul.bf16.gmra.mxu3 %v826_v59 }
 0x3bc   :  { %v767_v60 = vpop.f32.mrf.mxu1 }
 0x3bd   :  { %v768_v7 = vadd.f32 %v767_v60, %v1948_v49 }
 0x3be   :  { %v720_v62 = vpop.f32.mrf.mxu0 }
 0x3bf   :  { %v721_v0 = vadd.f32 %v720_v62, %v1945_v51  ;;  %v804_v15 = vmax.f32 %v768_v7, 0.0 }
 0x3c1   :  { %v805_v5 = vmax.f32 %v721_v0, 0.0 }
 0x3c3   :  { %v827_v17 = vpack.c.bf16 %v805_v5, %v803_v3 }
 0x3c4   :  { %v769_v10 = vpop.f32.mrf.mxu1 }
 0x3c5   :  { %v770_v12 = vadd.f32 %v769_v10, %v1948_v49  ;;  %911 = vmatmul.bf16.gmra.mxu2 %v827_v17 }
 0x3c6   :  { %v723_v14 = vpop.f32.mrf.mxu0 }
 0x3c7   :  { %v806_v16 = vmax.f32 %v770_v12, 0.0  ;;  %v724_v23 = vadd.f32 %v723_v14, %v1945_v51 }
 0x3c9   :  { %v828_v19 = vpack.c.bf16 %v806_v16, %v804_v15  ;;  %v807_v30 = vmax.f32 %v724_v23, 0.0 }
 0x3cb   :  { %960 = vmatmul.bf16.gmra.mxu3 %v828_v19 }
 0x3cc   :  { %v772_v21 = vpop.f32.mrf.mxu1 }
 0x3cd   :  { %v773_v41 = vadd.f32 %v772_v21, %v1948_v49 }
 0x3ce   :  { %v725_v24 = vpop.f32.mrf.mxu0 }
 0x3cf   :  { %v726_v26 = vadd.f32 %v725_v24, %v1945_v51  ;;  %v808_v57 = vmax.f32 %v773_v41, 0.0 }
 0x3d1   :  { %v809_v32 = vmax.f32 %v726_v26, 0.0 }
 0x3d3   :  { %v829_v43 = vpack.c.bf16 %v809_v32, %v807_v30 }
 0x3d4   :  { %v774_v44 = vpop.f32.mrf.mxu1 }
 0x3d5   :  { %v775_v53 = vadd.f32 %v774_v44, %v1948_v49  ;;  %916 = vmatmul.bf16.gmra.mxu2 %v829_v43 }
 0x3d6   :  { %v728_v56 = vpop.f32.mrf.mxu0 }
 0x3d7   :  { %v810_v63 = vmax.f32 %v775_v53, 0.0  ;;  %v729_v4 = vadd.f32 %v728_v56, %v1945_v51 }
 0x3d9   :  { %v830_v1 = vpack.c.bf16 %v810_v63, %v808_v57  ;;  %v811_v54 = vmax.f32 %v729_v4, 0.0 }
 0x3db   :  { %965 = vmatmul.bf16.gmra.mxu3 %v830_v1 }
 0x3dc   :  { %v777_v2 = vpop.f32.mrf.mxu1 }
 0x3dd   :  { %v778_v33 = vadd.f32 %v777_v2, %v1948_v49 }
 0x3de   :  { %v730_v8 = vpop.f32.mrf.mxu0 }
 0x3df   :  { %v731_v13 = vadd.f32 %v730_v8, %v1945_v51  ;;  %v812_v11 = vmax.f32 %v778_v33, 0.0 }
 0x3e1   :  { %v813_v27 = vmax.f32 %v731_v13, 0.0 }
 0x3e3   :  { %v831_v38 = vpack.c.bf16 %v813_v27, %v811_v54 }
 0x3e4   :  { %v779_v20 = vpop.f32.mrf.mxu1 }
 0x3e5   :  { %v780_v37 = vadd.f32 %v779_v20, %v1948_v49  ;;  %921 = vmatmul.bf16.gmra.mxu2 %v831_v38 }
 0x3e6   :  { %v733_v31 = vpop.f32.mrf.mxu0 }
 0x3e7   :  { %v814_v18 = vmax.f32 %v780_v37, 0.0  ;;  %v734_v28 = vadd.f32 %v733_v31, %v1945_v51 }
 0x3e9   :  { %v832_v25 = vpack.c.bf16 %v814_v18, %v812_v11  ;;  %v815_v36 = vmax.f32 %v734_v28, 0.0 }
 0x3eb   :  { %970 = vmatmul.bf16.gmra.mxu3 %v832_v25 }
 0x3ec   :  { %v782_v6 = vpop.f32.mrf.mxu1 }
 0x3ed   :  { %v783_v42 = vadd.f32 %v782_v6, %v1948_v49 }
 0x3ee   :  { %v735_v34 = vpop.f32.mrf.mxu0 }
 0x3ef   :  { %v736_v29 = vadd.f32 %v735_v34, %v1945_v51  ;;  %v816_v55 = vmax.f32 %v783_v42, 0.0 }
 0x3f1   :  { %v817_v40 = vmax.f32 %v736_v29, 0.0 }
 0x3f3   :  { %v833_v35 = vpack.c.bf16 %v817_v40, %v815_v36 }
 0x3f4   :  { %v784_v48 = vpop.f32.mrf.mxu1 }
 0x3f5   :  { %v785_v50 = vadd.f32 %v784_v48, %v1948_v49  ;;  %926 = vmatmul.bf16.gmra.mxu2 %v833_v35 }
 0x3f7   :  { %v818_v59 = vmax.f32 %v785_v50, 0.0 }
 0x3f9   :  { %v834_v60 = vpack.c.bf16 %v818_v59, %v816_v55 }
 0x3fb   :  { %975 = vmatmul.bf16.gmra.mxu3 %v834_v60 }
 0x408   :  { %v892_v45 = vpop.f32.mrf.mxu2 }
 0x40e   :  { %v941_v62 = vpop.f32.mrf.mxu3 }
 0x40f   :  { %v942_v0 = vadd.f32 %v941_v62, %v892_v45  ;;  %v1042_v45 = vlaneseq }
 0x410   :  { %v894_v3 = vpop.f32.mrf.mxu2 }
 0x411   :  { %v1989_v62 = vand.u32 127, %v1042_v45 }
 0x413   :  { %vm1044_vm1 = vcmp.lt.s32.totalorder %v1989_v62, 8 }
 0x416   :  { %v943_v5 = vpop.f32.mrf.mxu3 }
 0x417   :  { %v944_v7 = vadd.f32 %v943_v5, %v894_v3 }
 0x418   :  { %v897_v51 = vpop.f32.mrf.mxu2 }
 0x419   :  { %v981_v17 = vpack.c.bf16 %v944_v7, %v942_v0 }
 0x41e   :  { %v946_v10 = vpop.f32.mrf.mxu3 }
 0x41f   :  { %v947_v12 = vadd.f32 %v946_v10, %v897_v51 }
 0x420   :  { %v899_v14 = vpop.f32.mrf.mxu2 }
 0x426   :  { %v948_v15 = vpop.f32.mrf.mxu3 }
 0x427   :  { %v949_v16 = vadd.f32 %v948_v15, %v899_v14 }
 0x428   :  { %v902_v19 = vpop.f32.mrf.mxu2 }
 0x429   :  { %v982_v49 = vpack.c.bf16 %v949_v16, %v947_v12 }
 0x42e   :  { %v951_v21 = vpop.f32.mrf.mxu3 }
 0x42f   :  { %v952_v23 = vadd.f32 %v951_v21, %v902_v19 }
 0x430   :  { %v904_v24 = vpop.f32.mrf.mxu2 }
 0x436   :  { %v953_v26 = vpop.f32.mrf.mxu3 }
 0x437   :  { %v954_v30 = vadd.f32 %v953_v26, %v904_v24 }
 0x438   :  { %v907_v32 = vpop.f32.mrf.mxu2 }
 0x439   :  { %v983_v41 = vpack.c.bf16 %v954_v30, %v952_v23 }
 0x43e   :  { %v956_v43 = vpop.f32.mrf.mxu3 }
 0x43f   :  { %v957_v44 = vadd.f32 %v956_v43, %v907_v32 }
 0x440   :  { %v909_v53 = vpop.f32.mrf.mxu2 }
 0x446   :  { %v958_v56 = vpop.f32.mrf.mxu3 }
 0x447   :  { %v959_v57 = vadd.f32 %v958_v56, %v909_v53 }
 0x448   :  { %v912_v63 = vpop.f32.mrf.mxu2 }
 0x449   :  { %v984_v1 = vpack.c.bf16 %v959_v57, %v957_v44 }
 0x44e   :  { %v961_v2 = vpop.f32.mrf.mxu3 }
 0x44f   :  { %v962_v4 = vadd.f32 %v961_v2, %v912_v63 }
 0x450   :  { %v914_v8 = vpop.f32.mrf.mxu2 }
 0x456   :  { %v963_v13 = vpop.f32.mrf.mxu3 }
 0x457   :  { %v964_v55 = vadd.f32 %v963_v13, %v914_v8 }
 0x458   :  { %v917_v54 = vpop.f32.mrf.mxu2 }
 0x459   :  { %v985_v60 = vpack.c.bf16 %v964_v55, %v962_v4 }
 0x45e   :  { %v966_v27 = vpop.f32.mrf.mxu3 }
 0x45f   :  { %v967_v50 = vadd.f32 %v966_v27, %v917_v54 }
 0x460   :  { %v919_v33 = vpop.f32.mrf.mxu2 }
 0x466   :  { %v968_v38 = vpop.f32.mrf.mxu3 }
 0x467   :  { %v969_v35 = vadd.f32 %v968_v38, %v919_v33 }
 0x468   :  { %v922_v20 = vpop.f32.mrf.mxu2 }
 0x469   :  { %v986_v59 = vpack.c.bf16 %v969_v35, %v967_v50 }
 0x46e   :  { %v971_v37 = vpop.f32.mrf.mxu3 }
 0x46f   :  { %v972_v42 = vadd.f32 %v971_v37, %v922_v20 }
 0x470   :  { %v924_v31 = vpop.f32.mrf.mxu2 }
 0x476   :  { %v973_v11 = vpop.f32.mrf.mxu3 }
 0x477   :  { %v974_v36 = vadd.f32 %v973_v11, %v924_v31 }
 0x478   :  { %v927_v18 = vpop.f32.mrf.mxu2 }
 0x479   :  { %v987_v48 = vpack.c.bf16 %v974_v36, %v972_v42 }
 0x47e   :  { %v976_v25 = vpop.f32.mrf.mxu3 }
 0x47f   :  { %v977_v34 = vadd.f32 %v976_v25, %v927_v18 }
 0x480   :  { %v929_v6 = vpop.f32.mrf.mxu2 }
 0x486   :  { %v978_v28 = vpop.f32.mrf.mxu3 }
 0x487   :  { %v979_v29 = vadd.f32 %v978_v28, %v929_v6 }
 0x489   :  { %v988_v40 = vpack.c.bf16 %v979_v29, %v977_v34 }
 0x48b   :  { %993 = vmatpush.bf16.msrb.mxu0 %v988_v40 }
 0x48f   :  { %994 = vmatpush.bf16.msrb.mxu0 %v987_v48 }
 0x493   :  { %995 = vmatpush.bf16.msrb.mxu0 %v986_v59 }
 0x497   :  { %996 = vmatpush.bf16.msrb.mxu0 %v985_v60 }
 0x49b   :  { %997 = vmatpush.bf16.msrb.mxu0 %v984_v1 }
 0x49f   :  { %998 = vmatpush.bf16.msrb.mxu0 %v983_v41 }
 0x4a3   :  { %999 = vmatpush.bf16.msrb.mxu0 %v982_v49 }
 0x4a7   :  { %1000 = vmatpush.bf16.msrb.mxu0 %v981_v17 }
 0x4aa   :  { %1001 = vmatmul.bf16.vlgmr.msrb.gmra.mxu0 %v2259_v22  ;;  %v1994_v22 = vld [vmem:[%s2224_s7] ss:$0 sm:$0xff] }
 0x4ba   :  { %1006 = vmatmul.bf16.gmra.mxu0 %v2261_v39 }
 0x4ca   :  { %1011 = vmatmul.bf16.gmra.mxu0 %v2262_v52 }
 0x4da   :  { %1016 = vmatmul.bf16.gmra.mxu0 %v2263_v58 }
 0x4ea   :  { %1021 = vmatmul.bf16.gmra.mxu0 %v2264_v61 }
 0x4fa   :  { %1026 = vmatmul.bf16.gmra.mxu0 %v2265_v9 }
 0x50a   :  { %1031 = vmatmul.bf16.gmra.mxu0 %v2266_v47 }
 0x51a   :  { %1036 = vmatmul.bf16.gmra.mxu0 %v2267_v46 }
 0x527   :  { %v1002_v39 = vpop.f32.mrf.mxu0 }
 0x528   :  { %v1003_v52 = vadd.f32 %v1994_v22, %v1002_v39 }
 0x52a   :  { %v1045_v58 = vsel %vm1044_vm1, %v1003_v52, -inf }
 0x52b   :  { %1061 = vmax.xlane.f32.xlu0 %v1045_v58 }
 0x52f   :  { %v1004_v61 = vpop.f32.mrf.mxu0 }
 0x530   :  { %v1005_v9 = vadd.f32 %v1994_v22, %v1004_v61 }
 0x532   :  { %v2003_v47 = vsel %vm1044_vm1, %v1005_v9, -inf }
 0x533   :  { %1063 = vmax.xlane.f32.xlu0 %v2003_v47 }
 0x537   :  { %v1007_v46 = vpop.f32.mrf.mxu0 }
 0x538   :  { %v1008_v0 = vadd.f32 %v1994_v22, %v1007_v46 }
 0x53a   :  { %v2009_v3 = vsel %vm1044_vm1, %v1008_v0, -inf }
 0x53b   :  { %1065 = vmax.xlane.f32.xlu1 %v2009_v3 }
 0x53f   :  { %v1009_v5 = vpop.f32.mrf.mxu0 }
 0x540   :  { %v1010_v7 = vadd.f32 %v1994_v22, %v1009_v5 }
 0x542   :  { %v2015_v51 = vsel %vm1044_vm1, %v1010_v7, -inf }
 0x543   :  { %1067 = vmax.xlane.f32.xlu1 %v2015_v51 }
 0x547   :  { %v1012_v17 = vpop.f32.mrf.mxu0 }
 0x548   :  { %v1013_v10 = vadd.f32 %v1994_v22, %v1012_v17 }
 0x54a   :  { %v2021_v12 = vsel %vm1044_vm1, %v1013_v10, -inf }
 0x54b   :  { %1069 = vmax.xlane.f32.xlu2 %v2021_v12 }
 0x54f   :  { %v1014_v14 = vpop.f32.mrf.mxu0 }
 0x550   :  { %v1015_v15 = vadd.f32 %v1994_v22, %v1014_v14 }
 0x552   :  { %v2027_v16 = vsel %vm1044_vm1, %v1015_v15, -inf }
 0x553   :  { %1071 = vmax.xlane.f32.xlu2 %v2027_v16 }
 0x557   :  { %v1017_v19 = vpop.f32.mrf.mxu0 }
 0x558   :  { %v1018_v49 = vadd.f32 %v1994_v22, %v1017_v19 }
 0x55a   :  { %v2033_v21 = vsel %vm1044_vm1, %v1018_v49, -inf }
 0x55b   :  { %1073 = vmax.xlane.f32.xlu0 %v2033_v21 }
 0x55f   :  { %v1019_v23 = vpop.f32.mrf.mxu0 }
 0x560   :  { %v1020_v24 = vadd.f32 %v1994_v22, %v1019_v23 }
 0x562   :  { %v2039_v26 = vsel %vm1044_vm1, %v1020_v24, -inf }
 0x563   :  { %1075 = vmax.xlane.f32.xlu1 %v2039_v26 }
 0x567   :  { %v1022_v30 = vpop.f32.mrf.mxu0 }
 0x568   :  { %v1023_v32 = vadd.f32 %v1994_v22, %v1022_v30 }
 0x56a   :  { %v2045_v41 = vsel %vm1044_vm1, %v1023_v32, -inf }
 0x56b   :  { %1077 = vmax.xlane.f32.xlu2 %v2045_v41 }
 0x56f   :  { %v1024_v43 = vpop.f32.mrf.mxu0 }
 0x570   :  { %v1025_v44 = vadd.f32 %v1994_v22, %v1024_v43 }
 0x572   :  { %v2051_v53 = vsel %vm1044_vm1, %v1025_v44, -inf }
 0x573   :  { %1079 = vmax.xlane.f32.xlu0 %v2051_v53 }
 0x577   :  { %v1027_v56 = vpop.f32.mrf.mxu0 }
 0x578   :  { %v1028_v57 = vadd.f32 %v1994_v22, %v1027_v56 }
 0x57a   :  { %v2057_v63 = vsel %vm1044_vm1, %v1028_v57, -inf }
 0x57b   :  { %1081 = vmax.xlane.f32.xlu1 %v2057_v63 }
 0x57f   :  { %v1029_v1 = vpop.f32.mrf.mxu0 }
 0x580   :  { %v1030_v2 = vadd.f32 %v1994_v22, %v1029_v1 }
 0x582   :  { %v2063_v4 = vsel %vm1044_vm1, %v1030_v2, -inf }
 0x583   :  { %1083 = vmax.xlane.f32.xlu2 %v2063_v4 }
 0x587   :  { %v1032_v8 = vpop.f32.mrf.mxu0 }
 0x588   :  { %v1033_v13 = vadd.f32 %v1994_v22, %v1032_v8 }
 0x58a   :  { %v2069_v54 = vsel %vm1044_vm1, %v1033_v13, -inf }
 0x58b   :  { %1085 = vmax.xlane.f32.xlu0 %v2069_v54 }
 0x58f   :  { %v1034_v27 = vpop.f32.mrf.mxu0 }
 0x590   :  { %v1035_v33 = vadd.f32 %v1994_v22, %v1034_v27 }
 0x592   :  { %v2075_v38 = vsel %vm1044_vm1, %v1035_v33, -inf }
 0x593   :  { %1087 = vmax.xlane.f32.xlu1 %v2075_v38 }
 0x597   :  { %v1037_v20 = vpop.f32.mrf.mxu0 }
 0x598   :  { %v1038_v37 = vadd.f32 %v1994_v22, %v1037_v20 }
 0x59a   :  { %v2081_v31 = vsel %vm1044_vm1, %v1038_v37, -inf }
 0x59b   :  { %1089 = vmax.xlane.f32.xlu2 %v2081_v31 }
 0x59e   :  { %v1062_v11 = vpop.xlane.xlu0 %1061 }
 0x59f   :  { %v2084_v18 = vsub.f32 %v1045_v58, %v1062_v11  ;;  %v1039_v25 = vpop.f32.mrf.mxu0 }
 0x5a0   :  { %v1040_v6 = vadd.f32 %v1994_v22, %v1039_v25 }
 0x5a1   :  { %v1109_v28 = vmul.f32 1.442695, %v2084_v18 }
 0x5a2   :  { %v2090_v34 = vsel %vm1044_vm1, %v1040_v6, -inf }
 0x5a3   :  { %1261 = vpow2.f32 %v1109_v28  ;;  %1091 = vmax.xlane.f32.xlu0 %v2090_v34 }
 0x5a6   :  { %v1064_v29 = vpop.xlane.xlu0 %1063 }
 0x5a7   :  { %v2094_v36 = vsub.f32 %v2003_v47, %v1064_v29 }
 0x5a9   :  { %v1262_v40 = vpop.eup %1261  ;;  %v1111_v42 = vmul.f32 1.442695, %v2094_v36 }
 0x5aa   :  { %1141 = vadd.xlane.f32.xlu1 %v1262_v40 }
 0x5ab   :  { %1263 = vpow2.f32 %v1111_v42 }
 0x5ae   :  { %v1066_v35 = vpop.xlane.xlu1 %1065 }
 0x5af   :  { %v2098_v48 = vsub.f32 %v2009_v3, %v1066_v35 }
 0x5b1   :  { %v1264_v50 = vpop.eup %1263  ;;  %v1113_v55 = vmul.f32 1.442695, %v2098_v48 }
 0x5b2   :  { %1143 = vadd.xlane.f32.xlu2 %v1264_v50 }
 0x5b3   :  { %1265 = vpow2.f32 %v1113_v55 }
 0x5b6   :  { %v1068_v59 = vpop.xlane.xlu1 %1067 }
 0x5b7   :  { %v2102_v60 = vsub.f32 %v2015_v51, %v1068_v59 }
 0x5b9   :  { %v1266_v45 = vpop.eup %1265  ;;  %v1115_v62 = vmul.f32 1.442695, %v2102_v60 }
 0x5ba   :  { %1145 = vadd.xlane.f32.xlu0 %v1266_v45 }
 0x5bb   :  { %1267 = vpow2.f32 %v1115_v62 }
 0x5be   :  { %v1070_v22 = vpop.xlane.xlu2 %1069 }
 0x5bf   :  { %v2106_v39 = vsub.f32 %v2021_v12, %v1070_v22 }
 0x5c1   :  { %v1268_v52 = vpop.eup %1267  ;;  %v1117_v58 = vmul.f32 1.442695, %v2106_v39 }
 0x5c2   :  { %1147 = vadd.xlane.f32.xlu1 %v1268_v52 }
 0x5c3   :  { %1269 = vpow2.f32 %v1117_v58 }
 0x5c6   :  { %v1072_v61 = vpop.xlane.xlu2 %1071 }
 0x5c7   :  { %v2110_v9 = vsub.f32 %v2027_v16, %v1072_v61 }
 0x5c9   :  { %v1270_v47 = vpop.eup %1269  ;;  %v1119_v46 = vmul.f32 1.442695, %v2110_v9 }
 0x5ca   :  { %1149 = vadd.xlane.f32.xlu2 %v1270_v47 }
 0x5cb   :  { %1271 = vpow2.f32 %v1119_v46 }
 0x5ce   :  { %v1074_v0 = vpop.xlane.xlu0 %1073 }
 0x5cf   :  { %v2114_v3 = vsub.f32 %v2033_v21, %v1074_v0 }
 0x5d1   :  { %v1272_v5 = vpop.eup %1271  ;;  %v1121_v7 = vmul.f32 1.442695, %v2114_v3 }
 0x5d2   :  { %1151 = vadd.xlane.f32.xlu0 %v1272_v5 }
 0x5d3   :  { %1273 = vpow2.f32 %v1121_v7 }
 0x5d6   :  { %v1076_v51 = vpop.xlane.xlu1 %1075 }
 0x5d7   :  { %v2118_v17 = vsub.f32 %v2039_v26, %v1076_v51 }
 0x5d9   :  { %v1274_v10 = vpop.eup %1273  ;;  %v1123_v12 = vmul.f32 1.442695, %v2118_v17 }
 0x5da   :  { %1153 = vadd.xlane.f32.xlu1 %v1274_v10 }
 0x5db   :  { %1275 = vpow2.f32 %v1123_v12 }
 0x5de   :  { %v1078_v14 = vpop.xlane.xlu2 %1077 }
 0x5df   :  { %v2122_v15 = vsub.f32 %v2045_v41, %v1078_v14 }
 0x5e1   :  { %v1276_v16 = vpop.eup %1275  ;;  %v1125_v19 = vmul.f32 1.442695, %v2122_v15 }
 0x5e2   :  { %1155 = vadd.xlane.f32.xlu2 %v1276_v16 }
 0x5e3   :  { %1277 = vpow2.f32 %v1125_v19 }
 0x5e6   :  { %v1080_v49 = vpop.xlane.xlu0 %1079 }
 0x5e7   :  { %v2126_v21 = vsub.f32 %v2051_v53, %v1080_v49 }
 0x5e9   :  { %v1278_v23 = vpop.eup %1277  ;;  %v1127_v24 = vmul.f32 1.442695, %v2126_v21 }
 0x5ea   :  { %1157 = vadd.xlane.f32.xlu0 %v1278_v23 }
 0x5eb   :  { %1279 = vpow2.f32 %v1127_v24 }
 0x5ee   :  { %v1082_v26 = vpop.xlane.xlu1 %1081 }
 0x5ef   :  { %v2130_v30 = vsub.f32 %v2057_v63, %v1082_v26 }
 0x5f1   :  { %v1280_v32 = vpop.eup %1279  ;;  %v1129_v41 = vmul.f32 1.442695, %v2130_v30 }
 0x5f2   :  { %1159 = vadd.xlane.f32.xlu1 %v1280_v32 }
 0x5f3   :  { %1281 = vpow2.f32 %v1129_v41 }
 0x5f6   :  { %v1084_v43 = vpop.xlane.xlu2 %1083 }
 0x5f7   :  { %v2134_v44 = vsub.f32 %v2063_v4, %v1084_v43 }
 0x5f9   :  { %v1282_v53 = vpop.eup %1281  ;;  %v1131_v56 = vmul.f32 1.442695, %v2134_v44 }
 0x5fa   :  { %1161 = vadd.xlane.f32.xlu2 %v1282_v53 }
 0x5fb   :  { %1283 = vpow2.f32 %v1131_v56 }
 0x5fe   :  { %v1086_v57 = vpop.xlane.xlu0 %1085 }
 0x5ff   :  { %v2138_v1 = vsub.f32 %v2069_v54, %v1086_v57 }
 0x601   :  { %v1284_v63 = vpop.eup %1283  ;;  %v1133_v2 = vmul.f32 1.442695, %v2138_v1 }
 0x602   :  { %1163 = vadd.xlane.f32.xlu0 %v1284_v63 }
 0x603   :  { %1285 = vpow2.f32 %v1133_v2 }
 0x606   :  { %v1088_v8 = vpop.xlane.xlu1 %1087 }
 0x607   :  { %v2142_v13 = vsub.f32 %v2075_v38, %v1088_v8 }
 0x609   :  { %v1286_v4 = vpop.eup %1285  ;;  %v1135_v27 = vmul.f32 1.442695, %v2142_v13 }
 0x60a   :  { %1165 = vadd.xlane.f32.xlu1 %v1286_v4 }
 0x60b   :  { %1287 = vpow2.f32 %v1135_v27 }
 0x60e   :  { %v1090_v33 = vpop.xlane.xlu2 %1089 }
 0x60f   :  { %v2146_v20 = vsub.f32 %v2081_v31, %v1090_v33 }
 0x611   :  { %v1288_v54 = vpop.eup %1287  ;;  %v1137_v37 = vmul.f32 1.442695, %v2146_v20 }
 0x612   :  { %1167 = vadd.xlane.f32.xlu2 %v1288_v54 }
 0x613   :  { %1289 = vpow2.f32 %v1137_v37 }
 0x616   :  { %v1092_v11 = vpop.xlane.xlu0 %1091 }
 0x617   :  { %v2150_v25 = vsub.f32 %v2090_v34, %v1092_v11 }
 0x619   :  { %v1290_v38 = vpop.eup %1289  ;;  %v1139_v6 = vmul.f32 1.442695, %v2150_v25 }
 0x61a   :  { %1169 = vadd.xlane.f32.xlu0 %v1290_v38 }
 0x61b   :  { %1291 = vpow2.f32 %v1139_v6 }
 0x61d   :  { %v1142_v28 = vpop.xlane.xlu1 %1141 }
 0x61e   :  { %1293 = vlog2.f32 %v1142_v28 }
 0x621   :  { %v1292_v29 = vpop.eup %1291 }
 0x622   :  { %1171 = vadd.xlane.f32.xlu1 %v1292_v29 }
 0x624   :  { %v1294_v31 = vpop.eup %1293 }
 0x625   :  { %v1174_v40 = vmul.f32 0.6931472, %v1294_v31  ;;  %v1144_v42 = vpop.xlane.xlu2 %1143 }
 0x626   :  { %1295 = vlog2.f32 %v1144_v42 }
 0x627   :  { %v1205_v35 = vsub.f32 %v2084_v18, %v1174_v40 }
 0x629   :  { %1221 = vst [vmem:[%s2225_s8] sm:$0xff] %v1205_v35 }
 0x62c   :  { %v1296_v34 = vpop.eup %1295 }
 0x62d   :  { %v1176_v50 = vmul.f32 0.6931472, %v1296_v34  ;;  %v1146_v55 = vpop.xlane.xlu0 %1145 }
 0x62e   :  { %1297 = vlog2.f32 %v1146_v55 }
 0x62f   :  { %v1206_v59 = vsub.f32 %v2094_v36, %v1176_v50 }
 0x631   :  { %1222 = vst [vmem:[%s2225_s8 + $0x8] sm:$0xff] %v1206_v59 }
 0x634   :  { %v1298_v45 = vpop.eup %1297 }
 0x635   :  { %v1178_v62 = vmul.f32 0.6931472, %v1298_v45  ;;  %v1148_v22 = vpop.xlane.xlu1 %1147 }
 0x636   :  { %1299 = vlog2.f32 %v1148_v22 }
 0x637   :  { %v1207_v18 = vsub.f32 %v2098_v48, %v1178_v62 }
 0x639   :  { %1223 = vst [vmem:[%s2225_s8 + $0x10] sm:$0xff] %v1207_v18 }
 0x63c   :  { %v1300_v52 = vpop.eup %1299 }
 0x63d   :  { %v1180_v58 = vmul.f32 0.6931472, %v1300_v52  ;;  %v1150_v61 = vpop.xlane.xlu2 %1149 }
 0x63e   :  { %1301 = vlog2.f32 %v1150_v61 }
 0x63f   :  { %v1208_v36 = vsub.f32 %v2102_v60, %v1180_v58 }
 0x641   :  { %1224 = vst [vmem:[%s2225_s8 + $0x18] sm:$0xff] %v1208_v36 }
 0x644   :  { %v1302_v47 = vpop.eup %1301 }
 0x645   :  { %v1182_v46 = vmul.f32 0.6931472, %v1302_v47  ;;  %v1152_v0 = vpop.xlane.xlu0 %1151 }
 0x646   :  { %1303 = vlog2.f32 %v1152_v0 }
 0x647   :  { %v1209_v48 = vsub.f32 %v2106_v39, %v1182_v46 }
 0x649   :  { %1225 = vst [vmem:[%s2225_s8 + $0x20] sm:$0xff] %v1209_v48 }
 0x64c   :  { %v1304_v5 = vpop.eup %1303 }
 0x64d   :  { %v1184_v7 = vmul.f32 0.6931472, %v1304_v5  ;;  %v1154_v51 = vpop.xlane.xlu1 %1153 }
 0x64e   :  { %1305 = vlog2.f32 %v1154_v51 }
 0x64f   :  { %v1210_v60 = vsub.f32 %v2110_v9, %v1184_v7 }
 0x651   :  { %1226 = vst [vmem:[%s2225_s8 + $0x28] sm:$0xff] %v1210_v60 }
 0x654   :  { %v1306_v10 = vpop.eup %1305 }
 0x655   :  { %v1186_v12 = vmul.f32 0.6931472, %v1306_v10  ;;  %v1156_v14 = vpop.xlane.xlu2 %1155 }
 0x656   :  { %1307 = vlog2.f32 %v1156_v14 }
 0x657   :  { %v1211_v39 = vsub.f32 %v2114_v3, %v1186_v12 }
 0x659   :  { %1227 = vst [vmem:[%s2225_s8 + $0x30] sm:$0xff] %v1211_v39 }
 0x65c   :  { %v1308_v16 = vpop.eup %1307 }
 0x65d   :  { %v1188_v19 = vmul.f32 0.6931472, %v1308_v16  ;;  %v1158_v49 = vpop.xlane.xlu0 %1157 }
 0x65e   :  { %1309 = vlog2.f32 %v1158_v49 }
 0x65f   :  { %v1212_v9 = vsub.f32 %v2118_v17, %v1188_v19 }
 0x661   :  { %1228 = vst [vmem:[%s2225_s8 + $0x38] sm:$0xff] %v1212_v9 }
 0x664   :  { %v1310_v23 = vpop.eup %1309 }
 0x665   :  { %v1190_v24 = vmul.f32 0.6931472, %v1310_v23  ;;  %v1160_v26 = vpop.xlane.xlu1 %1159 }
 0x666   :  { %1311 = vlog2.f32 %v1160_v26 }
 0x667   :  { %v1213_v3 = vsub.f32 %v2122_v15, %v1190_v24 }
 0x669   :  { %1229 = vst [vmem:[%s2225_s8 + $0x40] sm:$0xff] %v1213_v3 }
 0x66c   :  { %v1312_v32 = vpop.eup %1311 }
 0x66d   :  { %v1192_v41 = vmul.f32 0.6931472, %v1312_v32  ;;  %v1162_v43 = vpop.xlane.xlu2 %1161 }
 0x66e   :  { %1313 = vlog2.f32 %v1162_v43 }
 0x66f   :  { %v1214_v17 = vsub.f32 %v2126_v21, %v1192_v41 }
 0x671   :  { %1230 = vst [vmem:[%s2225_s8 + $0x48] sm:$0xff] %v1214_v17 }
 0x674   :  { %v1314_v53 = vpop.eup %1313 }
 0x675   :  { %v1194_v56 = vmul.f32 0.6931472, %v1314_v53  ;;  %v1164_v57 = vpop.xlane.xlu0 %1163 }
 0x676   :  { %1315 = vlog2.f32 %v1164_v57 }
 0x677   :  { %v1215_v15 = vsub.f32 %v2130_v30, %v1194_v56 }
 0x679   :  { %1231 = vst [vmem:[%s2225_s8 + $0x50] sm:$0xff] %v1215_v15 }
 0x67c   :  { %v1316_v63 = vpop.eup %1315 }
 0x67d   :  { %v1196_v2 = vmul.f32 0.6931472, %v1316_v63  ;;  %v1166_v8 = vpop.xlane.xlu1 %1165 }
 0x67e   :  { %1317 = vlog2.f32 %v1166_v8 }
 0x67f   :  { %v1216_v21 = vsub.f32 %v2134_v44, %v1196_v2 }
 0x681   :  { %1232 = vst [vmem:[%s2225_s8 + $0x58] sm:$0xff] %v1216_v21 }
 0x684   :  { %v1318_v4 = vpop.eup %1317 }
 0x685   :  { %v1198_v27 = vmul.f32 0.6931472, %v1318_v4  ;;  %v1168_v33 = vpop.xlane.xlu2 %1167 }
 0x686   :  { %1319 = vlog2.f32 %v1168_v33 }
 0x687   :  { %v1217_v30 = vsub.f32 %v2138_v1, %v1198_v27 }
 0x689   :  { %1233 = vst [vmem:[%s2225_s8 + $0x60] sm:$0xff] %v1217_v30 }
 0x68c   :  { %v1320_v54 = vpop.eup %1319 }
 0x68d   :  { %v1200_v37 = vmul.f32 0.6931472, %v1320_v54  ;;  %v1170_v11 = vpop.xlane.xlu0 %1169 }
 0x68e   :  { %1321 = vlog2.f32 %v1170_v11 }
 0x68f   :  { %v1218_v44 = vsub.f32 %v2142_v13, %v1200_v37 }
 0x691   :  { %1234 = vst [vmem:[%s2225_s8 + $0x68] sm:$0xff] %v1218_v44 }
 0x694   :  { %v1322_v38 = vpop.eup %1321 }
 0x695   :  { %v1202_v6 = vmul.f32 0.6931472, %v1322_v38  ;;  %v1172_v28 = vpop.xlane.xlu1 %1171 }
 0x696   :  { %1323 = vlog2.f32 %v1172_v28 }
 0x697   :  { %v1219_v1 = vsub.f32 %v2146_v20, %v1202_v6 }
 0x699   :  { %1235 = vst [vmem:[%s2225_s8 + $0x70] sm:$0xff] %v1219_v1 }
 0x69c   :  { %v1324_v29 = vpop.eup %1323 }
 0x69d   :  { %v1204_v31 = vmul.f32 0.6931472, %v1324_v29 }
 0x69f   :  { %v1220_v40 = vsub.f32 %v2150_v25, %v1204_v31 }
 0x6a1   :  { %1236 = vst [vmem:[%s2225_s8 + $0x78] sm:$0xff] %v1220_v40 }

</bundles_post_ra>
